<compile_context>
chip_gen: v7x
topology: tpu7x:2x2x1
jax: 0.10.0
libtpu: 0.0.40
codegen_flags: <defaults>
</compile_context>

<pallas_src>
import functools

import jax
import jax.numpy as jnp
from jax.experimental import pallas as pl
from jax.experimental.pallas import tpu as pltpu


def _round_up(v, m):
    return (v + m - 1) // m * m


def _sph_pix_matmul_kernel(x_ref, g_ref, o_ref, acc_ref, *, precision):
    """One (TM, TP) x (TP, TN) MXU step of out = x2 @ G, f32 accumulation."""
    k = pl.program_id(2)

    @pl.when(k == 0)
    def _():
        acc_ref[...] = jnp.zeros_like(acc_ref)

    acc_ref[...] += jnp.dot(
        x_ref[...],
        g_ref[...],
        preferred_element_type=jnp.float32,
        precision=precision,
    )

    @pl.when(k == pl.num_programs(2) - 1)
    def _():
        o_ref[...] = acc_ref[...].astype(o_ref.dtype)


def _sph_pix_matmul(x2, g, *, tm=512, tn=512, tp=512):
    """out[m, n] = sum_p x2[m, p] * g[p, n] via a tiled Pallas MXU matmul."""
    M, P = x2.shape
    Pg, N = g.shape
    assert P == Pg, (P, Pg)

    # Hardware-friendly tiles: rows (sublanes) multiple of 8, P / N (lanes)
    # multiple of 128 so every load/store is lane-dense and unmasked.  Tile
    # caps of 512 keep the double-buffered VMEM footprint (~9 MiB for f32)
    # well under the default scoped limit on all generations (v5e/v6e 128 MiB,
    # v7x 64 MiB physical).
    TM = min(tm, _round_up(M, 8))
    TP = min(tp, _round_up(P, 128))
    TN = min(tn, _round_up(N, 128))
    Mp = _round_up(M, TM)
    Pp = _round_up(P, TP)
    Np = _round_up(N, TN)

    if (Mp, Pp) != (M, P):
        x2 = jnp.pad(x2, ((0, Mp - M), (0, Pp - P)))
    if (Pp, Np) != (P, N):
        g = jnp.pad(g, ((0, Pp - P), (0, Np - N)))

    grid = (Mp // TM, Np // TN, Pp // TP)   # reduction axis last

    precision = (jax.lax.Precision.HIGHEST
                 if x2.dtype == jnp.float32 else None)

    out = pl.pallas_call(
        functools.partial(_sph_pix_matmul_kernel, precision=precision),
        out_shape=jax.ShapeDtypeStruct((Mp, Np), x2.dtype),
        grid_spec=pltpu.PrefetchScalarGridSpec(
            num_scalar_prefetch=0,
            grid=grid,
            in_specs=[
                pl.BlockSpec((TM, TP), lambda i, j, k: (i, k)),
                pl.BlockSpec((TP, TN), lambda i, j, k: (k, j)),
            ],
            out_specs=pl.BlockSpec((TM, TN), lambda i, j, k: (i, j)),
            scratch_shapes=[pltpu.VMEM((TM, TN), jnp.float32)],
        ),
        compiler_params=pltpu.CompilerParams(
            dimension_semantics=("parallel", "parallel", "arbitrary"),
        ),
        cost_estimate=pl.CostEstimate(
            flops=2 * Mp * Np * Pp,
            transcendentals=0,
            bytes_accessed=(Mp * Pp + Pp * Np + Mp * Np) * x2.dtype.itemsize,
        ),
    )(x2, g)

    return out[:M, :N]


class SphPixelization:
    """Pallas/TPU version of the torch SphPixelization module.

    `index` has shape (8, N), laid out exactly as the torch module expects:
      rows 0..3 = x0, y0, x1, y1 (integer sample coordinates),
      rows 4..7 = wa, wb, wc, wd (bilinear weights).
    """

    def __init__(self, index):
        index = jnp.asarray(index)
        self.x0 = index[0, :].astype(jnp.int32)
        self.y0 = index[1, :].astype(jnp.int32)
        self.x1 = index[2, :].astype(jnp.int32)
        self.y1 = index[3, :].astype(jnp.int32)
        self.wa = index[4, :].astype(jnp.float32)
        self.wb = index[5, :].astype(jnp.float32)
        self.wc = index[6, :].astype(jnp.float32)
        self.wd = index[7, :].astype(jnp.float32)
        self.n_pix = int(index.shape[1])
        self._g_cache = {}

    def _gather_matrix(self, H, W, dtype):
        """Weighted one-hot (H*W, N) matrix: x2 @ G == the 4-tap gather."""
        key = (int(H), int(W), jnp.dtype(dtype).name)
        if key not in self._g_cache:
            P = H * W
            cols = jnp.arange(self.n_pix, dtype=jnp.int32)
            f_a = self.y0 * W + self.x0   # wa * x[:, :, y0, x0]
            f_b = self.y1 * W + self.x0   # wb * x[:, :, y1, x0]
            f_c = self.y0 * W + self.x1   # wc * x[:, :, y0, x1]
            f_d = self.y1 * W + self.x1   # wd * x[:, :, y1, x1]
            g = jnp.zeros((P, self.n_pix), jnp.float32)
            # .add (not .set) so coincident taps (clipped edges) accumulate,
            # matching wa*v + wb*v = (wa+wb)*v in the torch reference.
            g = g.at[f_a, cols].add(self.wa)
            g = g.at[f_b, cols].add(self.wb)
            g = g.at[f_c, cols].add(self.wc)
            g = g.at[f_d, cols].add(self.wd)
            self._g_cache[key] = g.astype(dtype)
        return self._g_cache[key]

    def __call__(self, x):
        B, C, H, W = x.shape
        # Weights are float, so compute in float (as in torch).
        cdt = x.dtype if jnp.issubdtype(x.dtype, jnp.floating) else jnp.float32
        g = self._gather_matrix(H, W, cdt)
        x2 = x.reshape(B * C, H * W).astype(cdt)
        out2 = _sph_pix_matmul(x2, g)
        return out2.reshape(B, C, 1, self.n_pix)


if __name__ == "__main__":
    key = jax.random.PRNGKey(0)
    B, C, H, W = 2, 4, 16, 16
    n_pix = 200  # number of spherical pixels (deliberately not a multiple of 128)

    k_y0, k_x0, k_w, k_x = jax.random.split(key, 4)
    y0 = jax.random.randint(k_y0, (n_pix,), 0, H - 1)
    x0 = jax.random.randint(k_x0, (n_pix,), 0, W - 1)
    y1 = jnp.clip(y0 + 1, 0, H - 1)
    x1 = jnp.clip(x0 + 1, 0, W - 1)
    w = jax.random.uniform(k_w, (4, n_pix), dtype=jnp.float32,
                           minval=0.05, maxval=1.0)
    w = w / jnp.sum(w, axis=0, keepdims=True)   # bilinear weights sum to 1
    index = jnp.concatenate(
        [jnp.stack([x0, y0, x1, y1]).astype(jnp.float32), w], axis=0)  # (8, N)

    x = jax.random.normal(k_x, (B, C, H, W), dtype=jnp.float32)

    mod = SphPixelization(index)
    out = jax.block_until_ready(mod(x))

    # Pure-JAX reference with the torch module's exact gather semantics.
    wa, wb, wc, wd = w[0], w[1], w[2], w[3]
    ref = (wa * x[:, :, y0, x0] + wb * x[:, :, y1, x0]
           + wc * x[:, :, y0, x1] + wd * x[:, :, y1, x1])[:, :, None, :]

    assert out.shape == (B, C, 1, n_pix), out.shape
    assert out.dtype == x.dtype, out.dtype
    assert jnp.allclose(out, ref, rtol=1e-5, atol=1e-5), \
        float(jnp.max(jnp.abs(out - ref)))

    print("KERNEL_OK")
</pallas_src>

<mosaic_0001>
module attributes {stable_mosaic.version = 11 : i64} {
  func.func @_sph_pix_matmul_kernel(%arg0: i32, %arg1: i32, %arg2: i32, %arg3: memref<8x256xf32, #tpu.memory_space<vmem>>, %arg4: memref<256x256xf32, #tpu.memory_space<vmem>>, %arg5: memref<8x256xf32, #tpu.memory_space<vmem>>, %arg6: memref<8x256xf32, #tpu.memory_space<vmem>>) attributes {dimension_semantics = [#tpu.dimension_semantics<parallel>, #tpu.dimension_semantics<parallel>, #tpu.dimension_semantics<arbitrary>], iteration_bounds = array<i64: 1, 1, 1>, scalar_prefetch = 0 : i64, scratch_operands = 1 : i64, tpu.core_type = #tpu.core_type<tc>, window_params = [{transform_indices = @transform_0, window_bounds = array<i64: 8, 256>}, {transform_indices = @transform_1, window_bounds = array<i64: 256, 256>}, {transform_indices = @transform_2, window_bounds = array<i64: 8, 256>}]} {
    %c0_i32 = arith.constant 0 : i32
    %0 = arith.cmpi eq, %arg2, %c0_i32 : i32
    %1 = arith.extui %0 : i1 to i32
    %c0_i32_0 = arith.constant 0 : i32
    %2 = arith.cmpi ne, %1, %c0_i32_0 : i32
    scf.if %2 {
      %cst_10 = arith.constant 0.000000e+00 : f32
      %12 = vector.broadcast %cst_10 : f32 to vector<8x256xf32>
      %c0_11 = arith.constant 0 : index
      %c0_12 = arith.constant 0 : index
      %13 = vector.load %arg6[%c0_11, %c0_12] : memref<8x256xf32, #tpu.memory_space<vmem>>, vector<8x256xf32>
      tpu.vector_store %arg6[%c0_11, %c0_12], %12 {strides = array<i32>} : memref<8x256xf32, #tpu.memory_space<vmem>>, vector<8x256xf32>,
    } else {
    }
    %c0 = arith.constant 0 : index
    %c0_1 = arith.constant 0 : index
    %3 = vector.load %arg6[%c0, %c0_1] : memref<8x256xf32, #tpu.memory_space<vmem>>, vector<8x256xf32>
    %c0_2 = arith.constant 0 : index
    %c0_3 = arith.constant 0 : index
    %4 = vector.load %arg3[%c0_2, %c0_3] : memref<8x256xf32, #tpu.memory_space<vmem>>, vector<8x256xf32>
    %c0_4 = arith.constant 0 : index
    %c0_5 = arith.constant 0 : index
    %5 = vector.load %arg4[%c0_4, %c0_5] : memref<256x256xf32, #tpu.memory_space<vmem>>, vector<256x256xf32>
    %cst = arith.constant dense<0.000000e+00> : vector<8x256xf32>
    %6 = tpu.matmul %4, %5, %cst {dimension_numbers = #tpu.dot_dimension_numbers<[1], [0], [0], [1], [0, 0, 1, 1], [], []>, precision = #tpu.contract_precision<fp32>} : vector<8x256xf32>, vector<256x256xf32>, vector<8x256xf32> -> vector<8x256xf32>
    %7 = arith.addf %3, %6 : vector<8x256xf32>
    %c0_6 = arith.constant 0 : index
    %c0_7 = arith.constant 0 : index
    %8 = vector.load %arg6[%c0_6, %c0_7] : memref<8x256xf32, #tpu.memory_space<vmem>>, vector<8x256xf32>
    tpu.vector_store %arg6[%c0_6, %c0_7], %7 {strides = array<i32>} : memref<8x256xf32, #tpu.memory_space<vmem>>, vector<8x256xf32>,
    %c0_i32_8 = arith.constant 0 : i32
    %9 = arith.cmpi eq, %arg2, %c0_i32_8 : i32
    %10 = arith.extui %9 : i1 to i32
    %c0_i32_9 = arith.constant 0 : i32
    %11 = arith.cmpi ne, %10, %c0_i32_9 : i32
    scf.if %11 {
      %c0_10 = arith.constant 0 : index
      %c0_11 = arith.constant 0 : index
      %12 = vector.load %arg6[%c0_10, %c0_11] : memref<8x256xf32, #tpu.memory_space<vmem>>, vector<8x256xf32>
      %c0_12 = arith.constant 0 : index
      %c0_13 = arith.constant 0 : index
      %13 = vector.load %arg5[%c0_12, %c0_13] : memref<8x256xf32, #tpu.memory_space<vmem>>, vector<8x256xf32>
      tpu.vector_store %arg5[%c0_12, %c0_13], %12 {strides = array<i32>} : memref<8x256xf32, #tpu.memory_space<vmem>>, vector<8x256xf32>,
    } else {
    }
    return
  }
  func.func @transform_0(%arg0: i32, %arg1: i32, %arg2: i32) -> (i32, i32) {
    %c0_i32 = arith.constant 0 : i32
    return %arg0, %arg2 : i32, i32
  }
  func.func @transform_1(%arg0: i32, %arg1: i32, %arg2: i32) -> (i32, i32) {
    %c0_i32 = arith.constant 0 : i32
    return %arg2, %arg1 : i32, i32
  }
  func.func @transform_2(%arg0: i32, %arg1: i32, %arg2: i32) -> (i32, i32) {
    %c0_i32 = arith.constant 0 : i32
    return %arg0, %arg1 : i32, i32
  }
}

</mosaic_0001>

<bundles_post_ra>
// kernel: tpu_custom_call.1
= control target key start
LH: loop header
LB: loop body
LE: loop exit
PB: predicated region body
PF: predicated region fallthrough
CT: control target
= control target key end

     0   :  { %7 = vsyncpa [#allocation4], 0  ;;  %s2708_s0 = inlined_call_operand.hbm [shape: f32[8,256], index: 0, kind: input, shape index: {}]   ;;  %s2709_s1 = inlined_call_operand.hbm [shape: f32[256,256], index: 1, kind: input, shape index: {}]   ;;  %s2710_s2 = inlined_call_operand.hbm [shape: f32[8,256], index: 2, kind: output, shape index: {}]  }
   0x1   :  { %8 = vsyncpa [#allocation7], 0 }
   0x2   :  { %9 = vsyncpa [#allocation5], 0  ;;  %s1894_s9 = smov [#allocation3]   ;;  %s1895_s11 = smov [#allocation6]  }
   0x3   :  { %s16_s10 = sshll.u32 %s1894_s9, 4  ;;  %s25_s12 = sshll.u32 %s1895_s11, 4  ;;  %s17_s10 = int_to_ptr.vmem [resolvable:$true] %s16_s10  ;;  %s1914_s12 = int_to_ptr.vmem [resolvable:$true] %s25_s12 }
   0x4   :  { %s1822_s15 = scalar_lea.hbm %s2708_s0, 256 }
   0x5   :  { %p1823_p0 = scmp.ne.s32.totalorder %s2708_s0, %s1822_s15  ;;  %p1826_p1 = scmp.lt.u32.totalorder %s1822_s15, %s2708_s0 }
   0x7   :  { %p1828_p2 = pnand %p1826_p1, %p1823_p0 }
   0x9   :  { %1831 = shalt.err (!%p1828_p2)
}
   0xa   :  { %s1832_s20 = scalar_lea.vmem %s17_s10, 256  ;;  %p1837_p4 = scmp.lt.s32.totalorder %s17_s10, %s17_s10 }
   0xb   :  { %p1833_p3 = scmp.ne.s32.totalorder %s17_s10, %s1832_s20  ;;  %p1838_p5 = scmp.lt.s32.totalorder %s1832_s20, %s1832_s20 }
   0xd   :  { %p1839_p6 = por %p1838_p5, %p1837_p4 }
   0xf   :  { %p1840_p7 = pnand %p1839_p6, %p1833_p3 }
  0x11   :  { %1843 = shalt.err (!%p1840_p7)
}
  0x12   :  { %19 = dma.hbm_to_vmem [thread:$0]  %s2708_s0, 256, %s17_s10, [#allocation4]  }
  0x13   :  { %s1844_s25 = scalar_lea.hbm %s2709_s1, 8192 }
  0x14   :  { %p1845_p8 = scmp.ne.s32.totalorder %s2709_s1, %s1844_s25  ;;  %p1848_p9 = scmp.lt.u32.totalorder %s1844_s25, %s2709_s1 }
  0x16   :  { %p1850_p10 = pnand %p1848_p9, %p1845_p8 }
  0x18   :  { %1853 = shalt.err (!%p1850_p10)
}
  0x19   :  { %s1854_s30 = scalar_lea.vmem %s1914_s12, 8192  ;;  %p1859_p12 = scmp.lt.s32.totalorder %s1914_s12, %s1914_s12 }
  0x1a   :  { %p1855_p11 = scmp.ne.s32.totalorder %s1914_s12, %s1854_s30  ;;  %p1860_p13 = scmp.lt.s32.totalorder %s1854_s30, %s1854_s30 }
  0x1c   :  { %p1861_p0 = por %p1860_p13, %p1859_p12 }
  0x1e   :  { %p1862_p1 = pnand %p1861_p0, %p1855_p11 }
  0x20   :  { %1865 = shalt.err (!%p1862_p1)
}
  0x21   :  { %s1896_s0 = smov 256   ;;  %s1897_s3 = smov 16  }
  0x22   :  { %31 = dma.hbm_to_vmem [thread:$0]  %s2709_s1, 8192, %s1914_s12, [#allocation7], %s1896_s0, %s1896_s0, %s1897_s3  }
  0x23   :  { %1888 = dma.done.wait [#allocation4], 256  }
  0x24   :  { %1889 = vsyncadd [#allocation4], 4294967040 }
  0x25   :  { %1890 = dma.done.wait [#allocation7], 8192  }
  0x26   :  { %1891 = vsyncadd [#allocation7], 4294959104  ;;  %v49_v0 = vld [vmem:[#allocation6 + $0x8] sm:$0xff]  ;;  %v51_v1 = vld [vmem:[#allocation6 + $0x18] sm:$0xff]  ;;  %s1898_s1 = smov [#allocation8]  }
  0x27   :  { %v48_v2 = vld [vmem:[#allocation6] sm:$0xff]  ;;  %v112_v3 = vand.u32 4294901760, %v49_v0  ;;  %v116_v4 = vand.u32 4294901760, %v51_v1  ;;  %v50_v5 = vld [vmem:[#allocation6 + $0x10] sm:$0xff]  ;;  %v53_v7 = vld [vmem:[#allocation6 + $0x28] sm:$0xff]  ;;  %s1413_s6 = sshll.u32 %s1898_s1, 4  ;;  %s1414_s6 = int_to_ptr.vmem [resolvable:$true] %s1413_s6 }
  0x28   :  { %v114_v6 = vand.u32 4294901760, %v48_v2  ;;  %v55_v8 = vld [vmem:[#allocation6 + $0x38] sm:$0xff]  ;;  %v118_v9 = vand.u32 4294901760, %v50_v5  ;;  %v120_v10 = vand.u32 4294901760, %v53_v7  ;;  %v52_v12 = vld [vmem:[#allocation6 + $0x20] sm:$0xff]  ;;  %v54_v13 = vld [vmem:[#allocation6 + $0x30] sm:$0xff]  ;;  %p1871_p3 = scmp.lt.s32.totalorder %s1414_s6, %s1414_s6 }
  0x29   :  { %v124_v11 = vand.u32 4294901760, %v55_v8  ;;  %v57_v14 = vld [vmem:[#allocation6 + $0x48] sm:$0xff]  ;;  %v1945_v15 = vpack.c.bf16 %v116_v4, %v112_v3  ;;  %v1947_v16 = vld [vmem:[#allocation6 + $0x58] sm:$0xff]  ;;  %v1949_v17 = vld [vmem:[#allocation6 + $0x40] sm:$0xff]  ;;  %v122_v23 = vand.u32 4294901760, %v52_v12  ;;  %v126_v24 = vand.u32 4294901760, %v54_v13 }
  0x2a   :  { %v1951_v18 = vld [vmem:[#allocation6 + $0x50] sm:$0xff]  ;;  %v1953_v19 = vpack.c.bf16 %v118_v9, %v114_v6  ;;  %v61_v21 = vld [vmem:[#allocation6 + $0x68] sm:$0xff]  ;;  %v63_v22 = vld [vmem:[#allocation6 + $0x78] sm:$0xff]  ;;  %v128_v25 = vand.u32 4294901760, %v57_v14  ;;  %v132_v26 = vand.u32 4294901760, %v1947_v16  ;;  %v130_v27 = vand.u32 4294901760, %v1949_v17 }
  0x2b   :  { %2858 = vst [vmem:[#allocation12_spill] sm:$0xff] %v1945_v15  ;;  %v1955_v20 = vpack.c.bf16 %v124_v11, %v120_v10  ;;  %1424 = vmatprep.subr.bf16.mxu1 %v1945_v15  ;;  %1616 = vmatprep.subr.bf16.mxu0 %v1945_v15  ;;  %v134_v28 = vand.u32 4294901760, %v1951_v18  ;;  %v1966_v29 = vpack.c.bf16 %v126_v24, %v122_v23  ;;  %v136_v30 = vand.u32 4294901760, %v61_v21  ;;  %v60_v32 = vld [vmem:[#allocation6 + $0x60] sm:$0xff]  ;;  %v62_v33 = vld [vmem:[#allocation6 + $0x70] sm:$0xff]  ;;  %v65_v35 = vld [vmem:[#allocation6 + $0x88] sm:$0xff] }
  0x2c   :  { %2859 = vst [vmem:[#allocation13_spill] sm:$0xff] %v1953_v19  ;;  %1426 = vmatpush1.bf16.msra.mxu1 %v1953_v19  ;;  %1618 = vmatpush1.bf16.msra.mxu0 %v1953_v19  ;;  %v140_v31 = vand.u32 4294901760, %v63_v22  ;;  %v1968_v34 = vpack.c.bf16 %v132_v26, %v128_v25  ;;  %v67_v36 = vld [vmem:[#allocation6 + $0x98] sm:$0xff]  ;;  %v138_v38 = vand.u32 4294901760, %v60_v32  ;;  %v142_v39 = vand.u32 4294901760, %v62_v33  ;;  %v64_v43 = vld [vmem:[#allocation6 + $0x80] sm:$0xff] }
  0x2d   :  { %2860 = vst [vmem:[#allocation14_spill] sm:$0xff] %v1955_v20  ;;  %1428 = vmatprep.subr.bf16.mxu1 %v1955_v20  ;;  %1620 = vmatprep.subr.bf16.mxu0 %v1955_v20  ;;  %2861 = vst [vmem:[#allocation15_spill] sm:$0xff] %v1966_v29  ;;  %v1972_v37 = vpack.c.bf16 %v134_v28, %v130_v27  ;;  %v144_v41 = vand.u32 4294901760, %v65_v35  ;;  %v148_v42 = vand.u32 4294901760, %v67_v36  ;;  %v66_v44 = vld [vmem:[#allocation6 + $0x90] sm:$0xff]  ;;  %v69_v48 = vld [vmem:[#allocation6 + $0xa8] sm:$0xff] }
  0x2e   :  { %2862 = vst [vmem:[#allocation16_spill] sm:$0xff] %v1968_v34  ;;  %v1976_v40 = vpack.c.bf16 %v140_v31, %v136_v30  ;;  %v1978_v45 = vsub.f32 %v49_v0, %v112_v3  ;;  %v1980_v46 = vsub.f32 %v51_v1, %v116_v4  ;;  %v1982_v47 = vsub.f32 %v48_v2, %v114_v6  ;;  %v71_v49 = vld [vmem:[#allocation6 + $0xb8] sm:$0xff]  ;;  %v68_v58 = vld [vmem:[#allocation6 + $0xa0] sm:$0xff]  ;;  %v70_v59 = vld [vmem:[#allocation6 + $0xb0] sm:$0xff]  ;;  %s1866_s7 = scalar_lea.vmem %s1414_s6, 256 }
  0x2f   :  { %2863 = vst [vmem:[#allocation17_spill] sm:$0xff] %v1972_v37  ;;  %v1984_v50 = vsub.f32 %v50_v5, %v118_v9  ;;  %v1986_v51 = vsub.f32 %v53_v7, %v120_v10  ;;  %v1988_v52 = vsub.f32 %v55_v8, %v124_v11  ;;  %v1990_v53 = vsub.f32 %v52_v12, %v122_v23  ;;  %v73_v0 = vld [vmem:[#allocation6 + $0xc8] sm:$0xff]  ;;  %v75_v1 = vld [vmem:[#allocation6 + $0xd8] sm:$0xff]  ;;  %v72_v10 = vld [vmem:[#allocation6 + $0xc0] sm:$0xff]  ;;  %p1867_p2 = scmp.ne.s32.totalorder %s1414_s6, %s1866_s7  ;;  %p1872_p4 = scmp.lt.s32.totalorder %s1866_s7, %s1866_s7 }
  0x30   :  { %1430 = vmatpush1.bf16.msra.mxu1 %v1966_v29  ;;  %1622 = vmatpush1.bf16.msra.mxu0 %v1966_v29  ;;  %2864 = vst [vmem:[#allocation18_spill] sm:$0xff] %v1976_v40  ;;  %2865 = vst [vmem:[#allocation19_spill] sm:$0xff] %v1978_v45  ;;  %v1992_v54 = vsub.f32 %v54_v13, %v126_v24  ;;  %v1996_v55 = vpack.c.bf16 %v142_v39, %v138_v38  ;;  %v146_v56 = vand.u32 4294901760, %v64_v43  ;;  %v74_v11 = vld [vmem:[#allocation6 + $0xd0] sm:$0xff]  ;;  %v79_v23 = vld [vmem:[#allocation6 + $0xf8] sm:$0xff] }
  0x31   :  { %1432 = vmatprep.subr.bf16.mxu1 %v1968_v34  ;;  %1624 = vmatprep.subr.bf16.mxu0 %v1968_v34  ;;  %2866 = vst [vmem:[#allocation20_spill] sm:$0xff] %v1980_v46  ;;  %2867 = vst [vmem:[#allocation21_spill] sm:$0xff] %v1982_v47  ;;  %v150_v57 = vand.u32 4294901760, %v66_v44  ;;  %v1998_v60 = vsub.f32 %v57_v14, %v128_v25  ;;  %v2002_v61 = vpack.c.bf16 %v148_v42, %v144_v41  ;;  %v91_v34 = vld [vmem:[#allocation6 + $0x158] sm:$0xff]  ;;  %v88_v20 = vld [vmem:[#allocation6 + $0x140] sm:$0xff]  ;;  %p1873_p5 = por %p1872_p4, %p1871_p3 }
  0x32   :  { %2868 = vst [vmem:[#allocation22_spill] sm:$0xff] %v1984_v50  ;;  %2869 = vst [vmem:[#allocation23_spill] sm:$0xff] %v1986_v51  ;;  %v152_v62 = vand.u32 4294901760, %v69_v48  ;;  %v156_v63 = vand.u32 4294901760, %v71_v49  ;;  %v2005_v2 = vsub.f32 %v1947_v16, %v132_v26  ;;  %v2008_v3 = vsub.f32 %v1949_v17, %v130_v27 }
  0x33   :  { %2870 = vst [vmem:[#allocation24_spill] sm:$0xff] %v1988_v52  ;;  %2871 = vst [vmem:[#allocation25_spill] sm:$0xff] %v1996_v55  ;;  %v2011_v4 = vsub.f32 %v1951_v18, %v134_v28  ;;  %v2013_v5 = vsub.f32 %v61_v21, %v136_v30  ;;  %v2015_v6 = vsub.f32 %v63_v22, %v140_v31  ;;  %v154_v8 = vand.u32 4294901760, %v68_v58  ;;  %v77_v22 = vld [vmem:[#allocation6 + $0xe8] sm:$0xff]  ;;  %v76_v28 = vld [vmem:[#allocation6 + $0xe0] sm:$0xff]  ;;  %p1874_p6 = pnand %p1873_p5, %p1867_p2 }
  0x34   :  { %1434 = vmatpush1.bf16.msra.mxu1 %v1972_v37  ;;  %1626 = vmatpush1.bf16.msra.mxu0 %v1972_v37  ;;  %2872 = vst [vmem:[#allocation26_spill] sm:$0xff] %v2002_v61  ;;  %2873 = vst [vmem:[#allocation27_spill] sm:$0xff] %v2008_v3  ;;  %v2017_v7 = vsub.f32 %v60_v32, %v138_v38  ;;  %v158_v9 = vand.u32 4294901760, %v70_v59  ;;  %v2020_v12 = vsub.f32 %v62_v33, %v142_v39  ;;  %v78_v30 = vld [vmem:[#allocation6 + $0xf0] sm:$0xff]  ;;  %v83_v38 = vld [vmem:[#allocation6 + $0x118] sm:$0xff] }
  0x35   :  { %1436 = vmatprep.subr.bf16.mxu1 %v1976_v40  ;;  %1628 = vmatprep.subr.bf16.mxu0 %v1976_v40  ;;  %2874 = vst [vmem:[#allocation28_spill] sm:$0xff] %v2011_v4  ;;  %2875 = vst [vmem:[#allocation29_spill] sm:$0xff] %v2013_v5  ;;  %v2023_v13 = vpack.c.bf16 %v150_v57, %v146_v56  ;;  %v160_v14 = vand.u32 4294901760, %v73_v0  ;;  %v164_v16 = vand.u32 4294901760, %v75_v1  ;;  %v162_v26 = vand.u32 4294901760, %v72_v10 }
  0x36   :  { %2876 = vst [vmem:[#allocation30_spill] sm:$0xff] %v2017_v7  ;;  %2877 = vst [vmem:[#allocation31_spill] sm:$0xff] %v2020_v12  ;;  %v2026_v17 = vsub.f32 %v65_v35, %v144_v41  ;;  %v2028_v18 = vsub.f32 %v67_v36, %v148_v42  ;;  %v2031_v21 = vpack.c.bf16 %v156_v63, %v152_v62  ;;  %v166_v27 = vand.u32 4294901760, %v74_v11  ;;  %v81_v36 = vld [vmem:[#allocation6 + $0x108] sm:$0xff] }
  0x37   :  { %2878 = vst [vmem:[#allocation32_spill] sm:$0xff] %v2023_v13  ;;  %v2033_v24 = vsub.f32 %v64_v43, %v146_v56  ;;  %v2035_v25 = vsub.f32 %v66_v44, %v150_v57  ;;  %v2037_v31 = vsub.f32 %v69_v48, %v152_v62  ;;  %v2039_v32 = vsub.f32 %v71_v49, %v156_v63  ;;  %v80_v44 = vld [vmem:[#allocation6 + $0x100] sm:$0xff]  ;;  %v82_v48 = vld [vmem:[#allocation6 + $0x110] sm:$0xff]  ;;  %v85_v62 = vld [vmem:[#allocation6 + $0x128] sm:$0xff] }
  0x38   :  { %1438 = vmatpush1.bf16.msra.mxu1 %v1996_v55  ;;  %1630 = vmatpush1.bf16.msra.mxu0 %v1996_v55  ;;  %2879 = vst [vmem:[#allocation33_spill] sm:$0xff] %v2026_v17  ;;  %2880 = vst [vmem:[#allocation34_spill] sm:$0xff] %v2028_v18  ;;  %v2041_v33 = vpack.c.bf16 %v158_v9, %v154_v8  ;;  %v2043_v35 = vsub.f32 %v68_v58, %v154_v8  ;;  %v168_v42 = vand.u32 4294901760, %v77_v22  ;;  %v87_v63 = vld [vmem:[#allocation6 + $0x138] sm:$0xff]  ;;  %v86_v55 = vld [vmem:[#allocation6 + $0x130] sm:$0xff] }
  0x39   :  { %1440 = vmatprep.subr.bf16.mxu1 %v2002_v61  ;;  %1632 = vmatprep.subr.bf16.mxu0 %v2002_v61  ;;  %2881 = vst [vmem:[#allocation35_spill] sm:$0xff] %v2031_v21  ;;  %2882 = vst [vmem:[#allocation36_spill] sm:$0xff] %v2033_v24  ;;  %v2047_v39 = vsub.f32 %v70_v59, %v158_v9  ;;  %v2049_v41 = vpack.c.bf16 %v164_v16, %v160_v14  ;;  %v172_v43 = vand.u32 4294901760, %v79_v23  ;;  %v84_v61 = vld [vmem:[#allocation6 + $0x120] sm:$0xff] }
  0x3a   :  { %2883 = vst [vmem:[#allocation37_spill] sm:$0xff] %v2035_v25  ;;  %2884 = vst [vmem:[#allocation38_spill] sm:$0xff] %v2037_v31  ;;  %v2053_v49 = vsub.f32 %v73_v0, %v160_v14  ;;  %v2055_v56 = vsub.f32 %v75_v1, %v164_v16  ;;  %v170_v57 = vand.u32 4294901760, %v76_v28  ;;  %v174_v58 = vand.u32 4294901760, %v78_v30 }
  0x3b   :  { %2885 = vst [vmem:[#allocation39_spill] sm:$0xff] %v2039_v32  ;;  %2886 = vst [vmem:[#allocation40_spill] sm:$0xff] %v2041_v33  ;;  %v2057_v59 = vpack.c.bf16 %v166_v27, %v162_v26  ;;  %v2059_v8 = vsub.f32 %v72_v10, %v162_v26  ;;  %v176_v9 = vand.u32 4294901760, %v81_v36  ;;  %v2061_v40 = vsub.f32 %v74_v11, %v166_v27 }
  0x3c   :  { %2887 = vst [vmem:[#allocation41_spill] sm:$0xff] %v2043_v35  ;;  %1442 = vmatpush1.bf16.msra.mxu1 %v2023_v13  ;;  %1634 = vmatpush1.bf16.msra.mxu0 %v2023_v13  ;;  %2888 = vst [vmem:[#allocation42_spill] sm:$0xff] %v2047_v39  ;;  %v180_v13 = vand.u32 4294901760, %v83_v38  ;;  %v2063_v37 = vsub.f32 %v77_v22, %v168_v42  ;;  %v178_v0 = vand.u32 4294901760, %v80_v44  ;;  %v182_v14 = vand.u32 4294901760, %v82_v48 }
  0x3d   :  { %2889 = vst [vmem:[#allocation43_spill] sm:$0xff] %v2049_v41  ;;  %1444 = vmatprep.subr.bf16.mxu1 %v2031_v21  ;;  %1636 = vmatprep.subr.bf16.mxu0 %v2031_v21  ;;  %2890 = vst [vmem:[#allocation44_spill] sm:$0xff] %v2053_v49  ;;  %v2067_v1 = vpack.c.bf16 %v172_v43, %v168_v42  ;;  %v2069_v16 = vsub.f32 %v79_v23, %v172_v43  ;;  %v184_v10 = vand.u32 4294901760, %v85_v62  ;;  %v89_v21 = vld [vmem:[#allocation6 + $0x148] sm:$0xff] }
  0x3e   :  { %2891 = vst [vmem:[#allocation45_spill] sm:$0xff] %v2055_v56  ;;  %2892 = vst [vmem:[#allocation46_spill] sm:$0xff] %v2057_v59  ;;  %v188_v26 = vand.u32 4294901760, %v87_v63  ;;  %v2073_v11 = vpack.c.bf16 %v174_v58, %v170_v57  ;;  %v2075_v22 = vsub.f32 %v76_v28, %v170_v57  ;;  %v186_v27 = vand.u32 4294901760, %v84_v61  ;;  %v93_v28 = vld [vmem:[#allocation6 + $0x168] sm:$0xff]  ;;  %v95_v57 = vld [vmem:[#allocation6 + $0x178] sm:$0xff] }
  0x3f   :  { %2893 = vst [vmem:[#allocation47_spill] sm:$0xff] %v2059_v8  ;;  %2894 = vst [vmem:[#allocation48_spill] sm:$0xff] %v2061_v40  ;;  %v190_v29 = vand.u32 4294901760, %v86_v55  ;;  %v2077_v42 = vsub.f32 %v78_v30, %v174_v58  ;;  %v2079_v23 = vpack.c.bf16 %v180_v13, %v176_v9  ;;  %v2081_v43 = vsub.f32 %v81_v36, %v176_v9 }
  0x40   :  { %2895 = vst [vmem:[#allocation49_spill] sm:$0xff] %v2063_v37  ;;  %1446 = vmatpush1.bf16.msra.mxu1 %v2041_v33  ;;  %1638 = vmatpush1.bf16.msra.mxu0 %v2041_v33  ;;  %2896 = vst [vmem:[#allocation50_spill] sm:$0xff] %v2067_v1  ;;  %v90_v33 = vld [vmem:[#allocation6 + $0x150] sm:$0xff]  ;;  %v2083_v19 = vsub.f32 %v83_v38, %v180_v13  ;;  %v2085_v15 = vpack.c.bf16 %v182_v14, %v178_v0  ;;  %v196_v37 = vand.u32 4294901760, %v91_v34  ;;  %v92_v13 = vld [vmem:[#allocation6 + $0x160] sm:$0xff] }
  0x41   :  { %2897 = vst [vmem:[#allocation51_spill] sm:$0xff] %v2069_v16  ;;  %1448 = vmatprep.subr.bf16.mxu1 %v2049_v41  ;;  %1640 = vmatprep.subr.bf16.mxu0 %v2049_v41  ;;  %2898 = vst [vmem:[#allocation52_spill] sm:$0xff] %v2073_v11  ;;  %v2087_v16 = vsub.f32 %v80_v44, %v178_v0  ;;  %v192_v41 = vand.u32 4294901760, %v89_v21  ;;  %v2091_v30 = vsub.f32 %v82_v48, %v182_v14  ;;  %v94_v38 = vld [vmem:[#allocation6 + $0x170] sm:$0xff] }
  0x42   :  { %2899 = vst [vmem:[#allocation53_spill] sm:$0xff] %v2075_v22  ;;  %2900 = vst [vmem:[#allocation54_spill] sm:$0xff] %v2077_v42  ;;  %v2093_v58 = vpack.c.bf16 %v188_v26, %v184_v10  ;;  %v194_v36 = vand.u32 4294901760, %v88_v20  ;;  %v198_v9 = vand.u32 4294901760, %v90_v33  ;;  %v2097_v44 = vsub.f32 %v85_v62, %v184_v10  ;;  %v96_v42 = vld [vmem:[#allocation6 + $0x180] sm:$0xff]  ;;  %v98_v22 = vld [vmem:[#allocation6 + $0x190] sm:$0xff] }
  0x43   :  { %2901 = vst [vmem:[#allocation55_spill] sm:$0xff] %v2079_v23  ;;  %2902 = vst [vmem:[#allocation56_spill] sm:$0xff] %v2081_v43  ;;  %v2099_v0 = vsub.f32 %v87_v63, %v188_v26  ;;  %v2103_v48 = vsub.f32 %v84_v61, %v186_v27  ;;  %v2105_v14 = vsub.f32 %v86_v55, %v190_v29  ;;  %v204_v43 = vand.u32 4294901760, %v95_v57  ;;  %v101_v63 = vld [vmem:[#allocation6 + $0x1a8] sm:$0xff]  ;;  %v103_v26 = vld [vmem:[#allocation6 + $0x1b8] sm:$0xff] }
  0x44   :  { %2903 = vst [vmem:[#allocation57_spill] sm:$0xff] %v2083_v19  ;;  %2904 = vst [vmem:[#allocation58_spill] sm:$0xff] %v2085_v15  ;;  %1450 = vmatpush1.bf16.msra.mxu1 %v2057_v59  ;;  %1642 = vmatpush1.bf16.msra.mxu0 %v2057_v59  ;;  %v97_v19 = vld [vmem:[#allocation6 + $0x188] sm:$0xff]  ;;  %v99_v59 = vld [vmem:[#allocation6 + $0x198] sm:$0xff]  ;;  %v2107_v40 = vpack.c.bf16 %v196_v37, %v192_v41  ;;  %v2109_v8 = vsub.f32 %v89_v21, %v192_v41  ;;  %v202_v62 = vand.u32 4294901760, %v92_v13 }
  0x45   :  { %2905 = vst [vmem:[#allocation59_spill] sm:$0xff] %v2087_v16  ;;  %2906 = vst [vmem:[#allocation60_spill] sm:$0xff] %v2091_v30  ;;  %1452 = vmatprep.subr.bf16.mxu1 %v2067_v1  ;;  %1644 = vmatprep.subr.bf16.mxu0 %v2067_v1  ;;  %v2101_v16 = vpack.c.bf16 %v190_v29, %v186_v27  ;;  %v200_v30 = vand.u32 4294901760, %v93_v28  ;;  %v206_v10 = vand.u32 4294901760, %v94_v38  ;;  %v208_v55 = vand.u32 4294901760, %v97_v19 }
  0x46   :  { %2907 = vst [vmem:[#allocation61_spill] sm:$0xff] %v2093_v58  ;;  %2908 = vst [vmem:[#allocation62_spill] sm:$0xff] %v2097_v44  ;;  %v2113_v61 = vsub.f32 %v91_v34, %v196_v37  ;;  %v2115_v29 = vpack.c.bf16 %v198_v9, %v194_v36  ;;  %v212_v27 = vand.u32 4294901760, %v99_v59  ;;  %v2119_v21 = vsub.f32 %v88_v20, %v194_v36 }
  0x47   :  { %2909 = vst [vmem:[#allocation63_spill] sm:$0xff] %v2099_v0  ;;  %2910 = vst [vmem:[#allocation64_spill] sm:$0xff] %v2101_v16  ;;  %v2121_v41 = vsub.f32 %v90_v33, %v198_v9  ;;  %v210_v1 = vand.u32 4294901760, %v96_v42  ;;  %v216_v34 = vand.u32 4294901760, %v101_v63  ;;  %v220_v37 = vand.u32 4294901760, %v103_v26  ;;  %v47_v33 = vld [vmem:[#allocation3 + $0x8] sm:$0xff] }
  0x48   :  { %2911 = vst [vmem:[#allocation65_spill] sm:$0xff] %v2103_v48  ;;  %2912 = vst [vmem:[#allocation66_spill] sm:$0xff] %v2105_v14  ;;  %1454 = vmatpush1.bf16.msra.mxu1 %v2073_v11  ;;  %1646 = vmatpush1.bf16.msra.mxu0 %v2073_v11  ;;  %v2123_v14 = vpack.c.bf16 %v204_v43, %v200_v30  ;;  %v2125_v48 = vsub.f32 %v93_v28, %v200_v30  ;;  %v100_v11 = vld [vmem:[#allocation6 + $0x1a0] sm:$0xff]  ;;  %v105_v9 = vld [vmem:[#allocation6 + $0x1c8] sm:$0xff] }
  0x49   :  { %2913 = vst [vmem:[#allocation67_spill] sm:$0xff] %v2107_v40  ;;  %2914 = vst [vmem:[#allocation68_spill] sm:$0xff] %v2109_v8  ;;  %1456 = vmatprep.subr.bf16.mxu1 %v2079_v23  ;;  %1648 = vmatprep.subr.bf16.mxu0 %v2079_v23  ;;  %v214_v8 = vand.u32 4294901760, %v98_v22  ;;  %v2127_v0 = vsub.f32 %v95_v57, %v204_v43  ;;  %v2129_v44 = vpack.c.bf16 %v206_v10, %v202_v62  ;;  %v107_v43 = vld [vmem:[#allocation6 + $0x1d8] sm:$0xff]  ;;  %v46_v57 = vld [vmem:[#allocation3] sm:$0xff] }
  0x4a   :  { %2915 = vst [vmem:[#allocation69_spill] sm:$0xff] %v2113_v61  ;;  %2916 = vst [vmem:[#allocation70_spill] sm:$0xff] %v2115_v29  ;;  %v102_v61 = vld [vmem:[#allocation6 + $0x1b0] sm:$0xff]  ;;  %v2131_v56 = vsub.f32 %v92_v13, %v202_v62  ;;  %v2133_v20 = vsub.f32 %v94_v38, %v206_v10  ;;  %v2137_v36 = vpack.c.bf16 %v212_v27, %v208_v55  ;;  %v218_v62 = vand.u32 4294901760, %v100_v11 }
  0x4b   :  { %2917 = vst [vmem:[#allocation71_spill] sm:$0xff] %v2119_v21  ;;  %2918 = vst [vmem:[#allocation72_spill] sm:$0xff] %v2121_v41  ;;  %v2139_v28 = vsub.f32 %v97_v19, %v208_v55  ;;  %v2141_v30 = vsub.f32 %v99_v59, %v212_v27  ;;  %v2145_v13 = vpack.c.bf16 %v214_v8, %v210_v1  ;;  %v222_v10 = vand.u32 4294901760, %v102_v61  ;;  %v106_v23 = vld [vmem:[#allocation6 + $0x1d0] sm:$0xff] }
  0x4c   :  { %2919 = vst [vmem:[#allocation73_spill] sm:$0xff] %v2123_v14  ;;  %2920 = vst [vmem:[#allocation74_spill] sm:$0xff] %v2125_v48  ;;  %1458 = vmatpush1.bf16.msra.mxu1 %v2085_v15  ;;  %1650 = vmatpush1.bf16.msra.mxu0 %v2085_v15  ;;  %v2147_v38 = vsub.f32 %v96_v42, %v210_v1  ;;  %v104_v15 = vld [vmem:[#allocation6 + $0x1c0] sm:$0xff]  ;;  %v2151_v19 = vpack.c.bf16 %v220_v37, %v216_v34  ;;  %v2155_v55 = vand.u32 4294901760, %v47_v33  ;;  %v109_v42 = vld [vmem:[#allocation6 + $0x1e8] sm:$0xff] }
  0x4d   :  { %2921 = vst [vmem:[#allocation75_spill] sm:$0xff] %v2127_v0  ;;  %2922 = vst [vmem:[#allocation76_spill] sm:$0xff] %v2129_v44  ;;  %1460 = vmatprep.subr.bf16.mxu1 %v2093_v58  ;;  %1652 = vmatprep.subr.bf16.mxu0 %v2093_v58  ;;  %v2153_v59 = vsub.f32 %v101_v63, %v216_v34  ;;  %v2157_v27 = vsub.f32 %v103_v26, %v220_v37  ;;  %v228_v58 = vand.u32 4294901760, %v107_v43 }
  0x4e   :  { %2923 = vst [vmem:[#allocation77_spill] sm:$0xff] %v2131_v56  ;;  %2924 = vst [vmem:[#allocation78_spill] sm:$0xff] %v2133_v20  ;;  %v2149_v20 = vsub.f32 %v98_v22, %v214_v8  ;;  %v2163_v1 = vsub.f32 %v100_v11, %v218_v62  ;;  %v226_v8 = vand.u32 4294901760, %v104_v15  ;;  %v230_v22 = vand.u32 4294901760, %v106_v23 }
  0x4f   :  { %2925 = vst [vmem:[#allocation79_spill] sm:$0xff] %v2137_v36  ;;  %2926 = vst [vmem:[#allocation80_spill] sm:$0xff] %v2139_v28  ;;  %v2159_v28 = vand.u32 4294901760, %v46_v57  ;;  %v2166_v63 = vsub.f32 %v47_v33, %v2155_v55  ;;  %v2170_v26 = vpack.c.bf16 %v222_v10, %v218_v62  ;;  %v2172_v34 = vsub.f32 %v102_v61, %v222_v10 }
  0x50   :  { %2927 = vst [vmem:[#allocation81_spill] sm:$0xff] %v2141_v30  ;;  %2928 = vst [vmem:[#allocation82_spill] sm:$0xff] %v2145_v13  ;;  %v224_v30 = vand.u32 4294901760, %v105_v9  ;;  %1462 = vmatpush1.bf16.msra.mxu1 %v2101_v16  ;;  %1654 = vmatpush1.bf16.msra.mxu0 %v2101_v16  ;;  %v259_v11 = vand.u32 4294901760, %v1978_v45  ;;  %v265_v33 = vand.u32 4294901760, %v1982_v47  ;;  %v232_v62 = vand.u32 4294901760, %v109_v42 }
  0x51   :  { %2929 = vst [vmem:[#allocation83_spill] sm:$0xff] %v2147_v38  ;;  %2930 = vst [vmem:[#allocation84_spill] sm:$0xff] %v2149_v20  ;;  %1464 = vmatprep.subr.bf16.mxu1 %v2107_v40  ;;  %1656 = vmatprep.subr.bf16.mxu0 %v2107_v40  ;;  %v242_v16 = vand.u32 4294901760, %v2166_v63  ;;  %v2183_v40 = vsub.f32 %v107_v43, %v228_v58  ;;  %v2186_v61 = vsub.f32 %v46_v57, %v2159_v28 }
  0x52   :  { %2931 = vst [vmem:[#allocation85_spill] sm:$0xff] %v2151_v19  ;;  %2932 = vst [vmem:[#allocation86_spill] sm:$0xff] %v2153_v59  ;;  %v2174_v37 = vsub.f32 %v105_v9, %v224_v30  ;;  %v277_v59 = vand.u32 4294901760, %v1984_v50  ;;  %v2181_v20 = vpack.c.bf16 %v228_v58, %v224_v30  ;;  %v2190_v9 = vpack.c.bf16 %v230_v22, %v226_v8 }
  0x53   :  { %2933 = vst [vmem:[#allocation87_spill] sm:$0xff] %v2155_v55  ;;  %2934 = vst [vmem:[#allocation88_spill] sm:$0xff] %v2157_v27  ;;  %v111_v27 = vld [vmem:[#allocation6 + $0x1f8] sm:$0xff]  ;;  %v243_v38 = vsub.f32 %v2166_v63, %v242_v16  ;;  %v283_v30 = vand.u32 4294901760, %v1986_v51  ;;  %v2196_v58 = vsub.f32 %v104_v15, %v226_v8  ;;  %v2198_v43 = vsub.f32 %v106_v23, %v230_v22 }
  0x54   :  { %2935 = vst [vmem:[#allocation89_spill] sm:$0xff] %v2159_v28  ;;  %2936 = vst [vmem:[#allocation90_spill] sm:$0xff] %v2163_v1  ;;  %v271_v1 = vand.u32 4294901760, %v1980_v46  ;;  %1466 = vmatpush1.bf16.msra.mxu1 %v2115_v29  ;;  %1658 = vmatpush1.bf16.msra.mxu0 %v2115_v29  ;;  %v236_v10 = vand.u32 4294901760, %v111_v27  ;;  %v260_v57 = vsub.f32 %v1978_v45, %v259_v11  ;;  %v295_v29 = vand.u32 4294901760, %v1988_v52 }
  0x55   :  { %2937 = vst [vmem:[#allocation91_spill] sm:$0xff] %v2166_v63  ;;  %2938 = vst [vmem:[#allocation92_spill] sm:$0xff] %v2170_v26  ;;  %1468 = vmatprep.subr.bf16.mxu1 %v2123_v14  ;;  %1660 = vmatprep.subr.bf16.mxu0 %v2123_v14  ;;  %v244_v28 = vand.u32 4294901760, %v243_v38  ;;  %v266_v63 = vsub.f32 %v1982_v47, %v265_v33  ;;  %v278_v56 = vsub.f32 %v1984_v50, %v277_v59 }
  0x56   :  { %2939 = vst [vmem:[#allocation93_spill] sm:$0xff] %v2172_v34  ;;  %2940 = vst [vmem:[#allocation94_spill] sm:$0xff] %v2174_v37  ;;  %v108_v37 = vld [vmem:[#allocation6 + $0x1e0] sm:$0xff]  ;;  %v110_v34 = vld [vmem:[#allocation6 + $0x1f0] sm:$0xff]  ;;  %984 = vmatprep.mubr.f32.mxu0 %v242_v16  ;;  %v2205_v0 = vsub.f32 %v109_v42, %v232_v62  ;;  %v284_v23 = vsub.f32 %v1986_v51, %v283_v30  ;;  %v296_v38 = vsub.f32 %v1988_v52, %v295_v29 }
  0x57   :  { %2941 = vst [vmem:[#allocation95_spill] sm:$0xff] %v2181_v20  ;;  %2942 = vst [vmem:[#allocation96_spill] sm:$0xff] %v2183_v40  ;;  %v272_v40 = vsub.f32 %v1980_v46, %v271_v1  ;;  %v234_v48 = vand.u32 4294901760, %v108_v37  ;;  %v238_v14 = vand.u32 4294901760, %v110_v34  ;;  %v289_v16 = vand.u32 4294901760, %v1990_v53  ;;  %245 = vmatprep.mubr.f32.mxu1 %v244_v28 }
  0x58   :  { %2943 = vst [vmem:[#allocation97_spill] sm:$0xff] %v2186_v61  ;;  %2944 = vst [vmem:[#allocation98_spill] sm:$0xff] %v2190_v9  ;;  %1470 = vmatpush1.bf16.msra.mxu1 %v2129_v44  ;;  %1662 = vmatpush1.bf16.msra.mxu0 %v2129_v44  ;;  %v301_v8 = vand.u32 4294901760, %v1992_v54  ;;  %v2216_v22 = vpack.c.bf16 %v236_v10, %v232_v62  ;;  %v2218_v42 = vsub.f32 %v111_v27, %v236_v10 }
  0x59   :  { %1472 = vmatprep.subr.bf16.mxu1 %v2137_v36  ;;  %1664 = vmatprep.subr.bf16.mxu0 %v2137_v36  ;;  %v2220_v15 = vsub.f32 %v108_v37, %v234_v48  ;;  %v261_v44 = vand.u32 4294901760, %v260_v57  ;;  %v273_v50 = vand.u32 4294901760, %v272_v40  ;;  %v267_v51 = vand.u32 4294901760, %v266_v63 }
  0x5a   :  { %2945 = vst [vmem:[#allocation99_spill] sm:$0xff] %v2216_v22  ;;  %v279_v47 = vand.u32 4294901760, %v278_v56  ;;  %v2222_v52 = vpack.c.bf16 %v238_v14, %v234_v48  ;;  %v2948_v46 = vand.u32 4294901760, %v2186_v61  ;;  %v307_v36 = vand.u32 4294901760, %v1998_v60 }
  0x5b   :  { %2946 = vst [vmem:[#allocation100_spill] sm:$0xff] %v2220_v15  ;;  %v319_v62 = vand.u32 4294901760, %v2005_v2  ;;  %v285_v28 = vand.u32 4294901760, %v284_v23  ;;  %v297_v27 = vand.u32 4294901760, %v296_v38  ;;  %v290_v40 = vsub.f32 %v1990_v53, %v289_v16 }
  0x5c   :  { %2947 = vst [vmem:[#allocation101_spill] sm:$0xff] %v2222_v52  ;;  %v2227_v45 = vsub.f32 %v2186_v61, %v2948_v46  ;;  %1474 = vmatpush1.bf16.msra.mxu1 %v2145_v13  ;;  %1666 = vmatpush1.bf16.msra.mxu0 %v2145_v13  ;;  %v302_v56 = vsub.f32 %v1992_v54, %v301_v8  ;;  %v313_v37 = vand.u32 4294901760, %v2008_v3  ;;  %v325_v38 = vand.u32 4294901760, %v2011_v4 }
  0x5d   :  { %1476 = vmatprep.subr.bf16.mxu1 %v2151_v19  ;;  %1668 = vmatprep.subr.bf16.mxu0 %v2151_v19  ;;  %v2237_v46 = vsub.f32 %v110_v34, %v238_v14  ;;  %v1679_v48 = vpack.c.bf16 %v271_v1, %v259_v11  ;;  %v2239_v63 = vpack.c.bf16 %v277_v59, %v265_v33  ;;  %v349_v1 = vand.u32 4294901760, %v2020_v12 }
  0x5e   :  { %v1487_v10 = vpack.c.bf16 %v273_v50, %v261_v44  ;;  %v2242_v57 = vpack.c.bf16 %v279_v47, %v267_v51  ;;  %v2244_v23 = vpack.c.bf16 %v295_v29, %v283_v30  ;;  %v250_v13 = vand.u32 4294901760, %v2227_v45 }
  0x5f   :  { %2949 = vst [vmem:[#allocation102_spill] sm:$0xff] %v2237_v46  ;;  %v2248_v15 = vpack.c.bf16 %v301_v8, %v289_v16  ;;  %v308_v19 = vsub.f32 %v1998_v60, %v307_v36  ;;  %v320_v14 = vsub.f32 %v2005_v2, %v319_v62  ;;  %v2254_v59 = vpack.c.bf16 %v297_v27, %v285_v28 }
  0x60   :  { %1478 = vmatpush1.bf16.msra.mxu1 %v2170_v26  ;;  %1670 = vmatpush1.bf16.msra.mxu0 %v2170_v26  ;;  %v291_v47 = vand.u32 4294901760, %v290_v40  ;;  %v303_v50 = vand.u32 4294901760, %v302_v56  ;;  %v331_v51 = vand.u32 4294901760, %v2013_v5  ;;  %v314_v45 = vsub.f32 %v2008_v3, %v313_v37 }
  0x61   :  { %1480 = vmatprep.subr.bf16.mxu1 %v2181_v20  ;;  %1672 = vmatprep.subr.bf16.mxu0 %v2181_v20  ;;  %v343_v44 = vand.u32 4294901760, %v2015_v6  ;;  %v337_v29 = vand.u32 4294901760, %v2017_v7  ;;  %v326_v34 = vsub.f32 %v2011_v4, %v325_v38  ;;  %v355_v11 = vand.u32 4294901760, %v2026_v17 }
  0x62   :  { %v367_v33 = vand.u32 4294901760, %v2028_v18  ;;  %v361_v30 = vand.u32 4294901760, %v2033_v24  ;;  %v309_v16 = vand.u32 4294901760, %v308_v19  ;;  %v321_v8 = vand.u32 4294901760, %v320_v14 }
  0x63   :  { %v2267_v28 = vpack.c.bf16 %v319_v62, %v307_v36  ;;  %v373_v27 = vand.u32 4294901760, %v2035_v25  ;;  %v1493_v40 = vpack.c.bf16 %v303_v50, %v291_v47  ;;  %v332_v56 = vsub.f32 %v2013_v5, %v331_v51 }
  0x64   :  { %1482 = vmatpush1.bf16.msra.mxu1 %v2190_v9  ;;  %1674 = vmatpush1.bf16.msra.mxu0 %v2190_v9  ;;  %v379_v20 = vand.u32 4294901760, %v2037_v31  ;;  %v391_v26 = vand.u32 4294901760, %v2039_v32  ;;  %v315_v19 = vand.u32 4294901760, %v314_v45  ;;  %v344_v36 = vsub.f32 %v2015_v6, %v343_v44 }
  0x65   :  { %1484 = vmatprep.subr.bf16.mxu1 %v2216_v22  ;;  %1676 = vmatprep.subr.bf16.mxu0 %v2216_v22  ;;  %v338_v62 = vsub.f32 %v2017_v7, %v337_v29  ;;  %v350_v14 = vsub.f32 %v2020_v12, %v349_v1  ;;  %v327_v46 = vand.u32 4294901760, %v326_v34  ;;  %v356_v47 = vsub.f32 %v2026_v17, %v355_v11 }
  0x66   :  { %v368_v50 = vsub.f32 %v2028_v18, %v367_v33  ;;  %v362_v9 = vsub.f32 %v2033_v24, %v361_v30  ;;  %v1495_v5 = vpack.c.bf16 %v321_v8, %v309_v16  ;;  %v2283_v4 = vpack.c.bf16 %v325_v38, %v313_v37 }
  0x67   :  { %v374_v3 = vsub.f32 %v2035_v25, %v373_v27  ;;  %v385_v45 = vand.u32 4294901760, %v2043_v35  ;;  %v333_v22 = vand.u32 4294901760, %v332_v56  ;;  %v2289_v12 = vpack.c.bf16 %v343_v44, %v331_v51 }
  0x68   :  { %1486 = vmatpush1.bf16.msra.mxu1 %v2222_v52  ;;  %1678 = vmatpush1.bf16.msra.mxu0 %v2222_v52  ;;  %v380_v34 = vsub.f32 %v2037_v31, %v379_v20  ;;  %v392_v18 = vsub.f32 %v2039_v32, %v391_v26  ;;  %v345_v16 = vand.u32 4294901760, %v344_v36  ;;  %v339_v37 = vand.u32 4294901760, %v338_v62  ;;  %v3006_v31 = vld [vmem:[#allocation54_spill] sm:$0xff] }
  0x69   :  { %1488 = vmatprep.subr.bf16.mxu1 %v1487_v10  ;;  %1680 = vmatprep.subr.bf16.mxu0 %v1679_v48  ;;  %v351_v38 = vand.u32 4294901760, %v350_v14  ;;  %v397_v8 = vand.u32 4294901760, %v2047_v39  ;;  %v1497_v25 = vpack.c.bf16 %v327_v46, %v315_v19  ;;  %v357_v24 = vand.u32 4294901760, %v356_v47  ;;  %v2951_v10 = vld [vmem:[#allocation45_spill] sm:$0xff]  ;;  %v2952_v14 = vld [vmem:[#allocation47_spill] sm:$0xff]  ;;  %v3022_v32 = vld [vmem:[#allocation78_spill] sm:$0xff] }
  0x6a   :  { %v369_v17 = vand.u32 4294901760, %v368_v50  ;;  %v363_v7 = vand.u32 4294901760, %v362_v9  ;;  %v2950_v56 = vand.u32 4294901760, %v2186_v61  ;;  %v375_v51 = vand.u32 4294901760, %v374_v3 }
  0x6b   :  { %251 = vmatmul.mubr.f32.vlgmr.msra.gmra.mrb[0].mxu1 %v250_v13  ;;  %v386_v44 = vsub.f32 %v2043_v35, %v385_v45  ;;  %v403_v52 = vand.u32 4294901760, %v2053_v49  ;;  %v415_v48 = vand.u32 4294901760, %v2951_v10  ;;  %v1693_v36 = vpack.c.bf16 %v349_v1, %v337_v29  ;;  %v2955_v1 = vld [vmem:[#allocation51_spill] sm:$0xff]  ;;  %v2964_v35 = vld [vmem:[#allocation65_spill] sm:$0xff] }
  0x6c   :  { %988 = vmatmul.mubr.f32.vlgmr.msra.gmra.mrb[0].mxu0 %v2950_v56  ;;  %1490 = vmatpush1.bf16.msra.mxu1 %v2242_v57  ;;  %v2301_v46 = vpack.c.bf16 %v367_v33, %v355_v11  ;;  %v381_v19 = vand.u32 4294901760, %v380_v34  ;;  %v393_v9 = vand.u32 4294901760, %v392_v18  ;;  %v1499_v3 = vpack.c.bf16 %v345_v16, %v333_v22  ;;  %v2957_v34 = vld [vmem:[#allocation54_spill] sm:$0xff] }
  0x6d   :  { %1682 = vmatpush1.bf16.msra.mxu0 %v2239_v63  ;;  %1492 = vmatprep.subr.bf16.mxu1 %v2254_v59  ;;  %v1501_v13 = vpack.c.bf16 %v351_v38, %v339_v37  ;;  %v398_v62 = vsub.f32 %v2047_v39, %v397_v8  ;;  %v409_v47 = vand.u32 4294901760, %v2952_v14  ;;  %v1503_v50 = vpack.c.bf16 %v369_v17, %v357_v24  ;;  %v2953_v63 = vld [vmem:[#allocation48_spill] sm:$0xff]  ;;  %v2959_v38 = vld [vmem:[#allocation57_spill] sm:$0xff] }
  0x6e   :  { %1684 = vmatprep.subr.bf16.mxu0 %v2244_v23  ;;  %v2307_v56 = vpack.c.bf16 %v373_v27, %v361_v30  ;;  %v2309_v57 = vpack.c.bf16 %v391_v26, %v379_v20  ;;  %v421_v29 = vand.u32 4294901760, %v2953_v63  ;;  %642 = vmatprep.mubr.f32.mxu1 %v2155_v55  ;;  %v2313_v18 = vpack.c.bf16 %v375_v51, %v363_v7  ;;  %v2954_v20 = vld [vmem:[#allocation49_spill] sm:$0xff] }
  0x6f   :  { %v387_v59 = vand.u32 4294901760, %v386_v44  ;;  %v404_v23 = vsub.f32 %v2053_v49, %v403_v52  ;;  %v416_v22 = vsub.f32 %v2951_v10, %v415_v48  ;;  %1251 = vmatprep.mubr.f32.mxu0 %v2155_v55  ;;  %v2319_v17 = vpack.c.bf16 %v393_v9, %v381_v19  ;;  %v2956_v30 = vld [vmem:[#allocation53_spill] sm:$0xff]  ;;  %v2963_v55 = vld [vmem:[#allocation63_spill] sm:$0xff] }
  0x70   :  { %1494 = vmatpush1.bf16.msra.mxu1 %v1493_v40  ;;  %v2321_v24 = vpack.c.bf16 %v397_v8, %v385_v45  ;;  %v427_v26 = vand.u32 4294901760, %v2954_v20  ;;  %v439_v11 = vand.u32 4294901760, %v2955_v1  ;;  %v399_v7 = vand.u32 4294901760, %v398_v62  ;;  %v2958_v45 = vld [vmem:[#allocation56_spill] sm:$0xff] }
  0x71   :  { %1686 = vmatpush1.bf16.msra.mxu0 %v2248_v15  ;;  %1496 = vmatprep.subr.bf16.mxu1 %v1495_v5  ;;  %v410_v33 = vsub.f32 %v2952_v14, %v409_v47  ;;  %v433_v27 = vand.u32 4294901760, %v2956_v30  ;;  %v445_v40 = vand.u32 4294901760, %v2957_v34  ;;  %v2329_v16 = vpack.c.bf16 %v415_v48, %v403_v52  ;;  %v2960_v5 = vld [vmem:[#allocation59_spill] sm:$0xff]  ;;  %v2962_v48 = vld [vmem:[#allocation62_spill] sm:$0xff] }
  0x72   :  { %1688 = vmatprep.subr.bf16.mxu0 %v2267_v28  ;;  %v422_v15 = vsub.f32 %v2953_v63, %v421_v29  ;;  %v451_v37 = vand.u32 4294901760, %v2958_v45  ;;  %v463_v8 = vand.u32 4294901760, %v2959_v38  ;;  %v405_v51 = vand.u32 4294901760, %v404_v23  ;;  %v2961_v28 = vld [vmem:[#allocation60_spill] sm:$0xff] }
  0x73   :  { %v417_v44 = vand.u32 4294901760, %v416_v22  ;;  %v457_v19 = vand.u32 4294901760, %v2960_v5  ;;  %v469_v9 = vand.u32 4294901760, %v2961_v28  ;;  %v428_v62 = vsub.f32 %v2954_v20, %v427_v26 }
  0x74   :  { %1498 = vmatpush1.bf16.msra.mxu1 %v1497_v25  ;;  %v440_v52 = vsub.f32 %v2955_v1, %v439_v11  ;;  %v475_v61 = vand.u32 4294901760, %v2962_v48  ;;  %v487_v63 = vand.u32 4294901760, %v2963_v55  ;;  %v1509_v23 = vpack.c.bf16 %v399_v7, %v387_v59 }
  0x75   :  { %1690 = vmatpush1.bf16.msra.mxu0 %v2283_v4  ;;  %1500 = vmatprep.subr.bf16.mxu1 %v1499_v3  ;;  %v411_v22 = vand.u32 4294901760, %v410_v33  ;;  %v434_v14 = vsub.f32 %v2956_v30, %v433_v27  ;;  %v446_v10 = vsub.f32 %v2957_v34, %v445_v40  ;;  %v423_v25 = vand.u32 4294901760, %v422_v15 }
  0x76   :  { %1692 = vmatprep.subr.bf16.mxu0 %v2289_v12  ;;  %v2344_v49 = vpack.c.bf16 %v421_v29, %v409_v47  ;;  %v452_v4 = vsub.f32 %v2958_v45, %v451_v37  ;;  %v464_v1 = vsub.f32 %v2959_v38, %v463_v8  ;;  %v1511_v20 = vpack.c.bf16 %v417_v44, %v405_v51  ;;  %v2965_v44 = vld [vmem:[#allocation66_spill] sm:$0xff] }
  0x77   :  { %v458_v39 = vsub.f32 %v2960_v5, %v457_v19  ;;  %v470_v3 = vsub.f32 %v2961_v28, %v469_v9  ;;  %v481_v12 = vand.u32 4294901760, %v2964_v35  ;;  %v429_v59 = vand.u32 4294901760, %v428_v62 }
  0x78   :  { %1502 = vmatpush1.bf16.msra.mxu1 %v1501_v13  ;;  %v441_v7 = vand.u32 4294901760, %v440_v52  ;;  %v476_v33 = vsub.f32 %v2962_v48, %v475_v61  ;;  %v488_v47 = vsub.f32 %v2963_v55, %v487_v63  ;;  %v1707_v29 = vpack.c.bf16 %v439_v11, %v427_v26  ;;  %v2966_v48 = vld [vmem:[#allocation68_spill] sm:$0xff]  ;;  %v3024_v55 = vld [vmem:[#allocation81_spill] sm:$0xff] }
  0x79   :  { %1694 = vmatpush1.bf16.msra.mxu0 %v1693_v36  ;;  %1504 = vmatprep.subr.bf16.mxu1 %v1503_v50  ;;  %v435_v15 = vand.u32 4294901760, %v434_v14  ;;  %v447_v51 = vand.u32 4294901760, %v446_v10  ;;  %v493_v5 = vand.u32 4294901760, %v2965_v44  ;;  %v1513_v38 = vpack.c.bf16 %v423_v25, %v411_v22  ;;  %v2967_v50 = vld [vmem:[#allocation69_spill] sm:$0xff] }
  0x7a   :  { %1696 = vmatprep.subr.bf16.mxu0 %v2301_v46  ;;  %v2355_v28 = vpack.c.bf16 %v445_v40, %v433_v27  ;;  %v453_v45 = vand.u32 4294901760, %v452_v4  ;;  %v465_v13 = vand.u32 4294901760, %v464_v1  ;;  %v459_v36 = vand.u32 4294901760, %v458_v39 }
  0x7b   :  { %v471_v62 = vand.u32 4294901760, %v470_v3  ;;  %v482_v52 = vsub.f32 %v2964_v35, %v481_v12  ;;  %v499_v34 = vand.u32 4294901760, %v2966_v48  ;;  %v1515_v46 = vpack.c.bf16 %v441_v7, %v429_v59  ;;  %v2971_v59 = vld [vmem:[#allocation78_spill] sm:$0xff] }
  0x7c   :  { %1506 = vmatpush1.bf16.msra.mxu1 %v2313_v18  ;;  %v477_v14 = vand.u32 4294901760, %v476_v33  ;;  %v489_v10 = vand.u32 4294901760, %v488_v47  ;;  %v511_v26 = vand.u32 4294901760, %v2967_v50  ;;  %v1517_v1 = vpack.c.bf16 %v447_v51, %v435_v15  ;;  %v2972_v33 = vld [vmem:[#allocation80_spill] sm:$0xff]  ;;  %v2973_v15 = vld [vmem:[#allocation81_spill] sm:$0xff] }
  0x7d   :  { %1698 = vmatpush1.bf16.msra.mxu0 %v2307_v56  ;;  %1508 = vmatprep.subr.bf16.mxu1 %v2319_v17  ;;  %v1711_v39 = vpack.c.bf16 %v463_v8, %v451_v37  ;;  %v494_v11 = vsub.f32 %v2965_v44, %v493_v5  ;;  %v505_v27 = vand.u32 4294901760, %v2119_v21  ;;  %v1519_v40 = vpack.c.bf16 %v465_v13, %v453_v45  ;;  %v2968_v37 = vld [vmem:[#allocation74_spill] sm:$0xff] }
  0x7e   :  { %1700 = vmatprep.subr.bf16.mxu0 %v2309_v57  ;;  %v2366_v22 = vpack.c.bf16 %v469_v9, %v457_v19  ;;  %v2368_v18 = vpack.c.bf16 %v487_v63, %v475_v61  ;;  %v517_v56 = vand.u32 4294901760, %v2121_v41  ;;  %v2371_v25 = vpack.c.bf16 %v471_v62, %v459_v36  ;;  %v2969_v61 = vld [vmem:[#allocation75_spill] sm:$0xff]  ;;  %v2970_v9 = vld [vmem:[#allocation77_spill] sm:$0xff]  ;;  %v2975_v62 = vld [vmem:[#allocation84_spill] sm:$0xff] }
  0x7f   :  { %v483_v4 = vand.u32 4294901760, %v482_v52  ;;  %v2373_v3 = vpack.c.bf16 %v493_v5, %v481_v12  ;;  %v500_v57 = vsub.f32 %v2966_v48, %v499_v34  ;;  %v2377_v17 = vpack.c.bf16 %v489_v10, %v477_v14  ;;  %v2974_v36 = vld [vmem:[#allocation83_spill] sm:$0xff]  ;;  %v2976_v52 = vld [vmem:[#allocation86_spill] sm:$0xff] }
  0x80   :  { %1510 = vmatpush1.bf16.msra.mxu1 %v1509_v23  ;;  %v512_v45 = vsub.f32 %v2967_v50, %v511_v26  ;;  %v523_v8 = vand.u32 4294901760, %v2968_v37  ;;  %v535_v63 = vand.u32 4294901760, %v2969_v61  ;;  %v495_v19 = vand.u32 4294901760, %v494_v11  ;;  %v2977_v11 = vld [vmem:[#allocation88_spill] sm:$0xff] }
  0x81   :  { %1702 = vmatpush1.bf16.msra.mxu0 %v2321_v24  ;;  %1512 = vmatprep.subr.bf16.mxu1 %v1511_v20  ;;  %v506_v5 = vsub.f32 %v2119_v21, %v505_v27  ;;  %v529_v12 = vand.u32 4294901760, %v2970_v9  ;;  %v541_v23 = vand.u32 4294901760, %v2971_v59  ;;  %v2386_v7 = vpack.c.bf16 %v511_v26, %v499_v34 }
  0x82   :  { %1704 = vmatprep.subr.bf16.mxu0 %v2329_v16  ;;  %v518_v24 = vsub.f32 %v2121_v41, %v517_v56  ;;  %v547_v47 = vand.u32 4294901760, %v2972_v33  ;;  %v559_v51 = vand.u32 4294901760, %v2973_v15  ;;  %v501_v13 = vand.u32 4294901760, %v500_v57 }
  0x83   :  { %v553_v20 = vand.u32 4294901760, %v2974_v36  ;;  %v565_v16 = vand.u32 4294901760, %v2975_v62  ;;  %v571_v14 = vand.u32 4294901760, %v2976_v52  ;;  %v513_v10 = vand.u32 4294901760, %v512_v45 }
  0x84   :  { %1514 = vmatpush1.bf16.msra.mxu1 %v1513_v38  ;;  %v524_v34 = vsub.f32 %v2968_v37, %v523_v8  ;;  %v536_v26 = vsub.f32 %v2969_v61, %v535_v63  ;;  %v583_v41 = vand.u32 4294901760, %v2977_v11  ;;  %v1525_v21 = vpack.c.bf16 %v495_v19, %v483_v4 }
  0x85   :  { %1706 = vmatpush1.bf16.msra.mxu0 %v2344_v49  ;;  %1516 = vmatprep.subr.bf16.mxu1 %v1515_v46  ;;  %v507_v57 = vand.u32 4294901760, %v506_v5  ;;  %v530_v50 = vsub.f32 %v2970_v9, %v529_v12  ;;  %v542_v48 = vsub.f32 %v2971_v59, %v541_v23  ;;  %v519_v44 = vand.u32 4294901760, %v518_v24 }
  0x86   :  { %1708 = vmatprep.subr.bf16.mxu0 %v1707_v29  ;;  %v2400_v35 = vpack.c.bf16 %v517_v56, %v505_v27  ;;  %v548_v49 = vsub.f32 %v2972_v33, %v547_v47  ;;  %v560_v38 = vsub.f32 %v2973_v15, %v559_v51  ;;  %v554_v45 = vsub.f32 %v2974_v36, %v553_v20  ;;  %v2978_v27 = vld [vmem:[#allocation90_spill] sm:$0xff]  ;;  %v2979_v36 = vld [vmem:[#allocation93_spill] sm:$0xff] }
  0x87   :  { %v566_v61 = vsub.f32 %v2975_v62, %v565_v16  ;;  %v572_v46 = vsub.f32 %v2976_v52, %v571_v14  ;;  %v584_v29 = vsub.f32 %v2977_v11, %v583_v41  ;;  %v1527_v4 = vpack.c.bf16 %v513_v10, %v501_v13 }
  0x88   :  { %1518 = vmatpush1.bf16.msra.mxu1 %v1517_v1  ;;  %v525_v19 = vand.u32 4294901760, %v524_v34  ;;  %v537_v5 = vand.u32 4294901760, %v536_v26  ;;  %v2852_v56 = vand.u32 4294901760, %v2978_v27  ;;  %v1723_v24 = vpack.c.bf16 %v535_v63, %v523_v8 }
  0x89   :  { %1710 = vmatpush1.bf16.msra.mxu0 %v2355_v28  ;;  %1520 = vmatprep.subr.bf16.mxu1 %v1519_v40  ;;  %v531_v15 = vand.u32 4294901760, %v530_v50  ;;  %v543_v33 = vand.u32 4294901760, %v542_v48  ;;  %v2851_v59 = vand.u32 4294901760, %v2979_v36  ;;  %v1529_v62 = vpack.c.bf16 %v519_v44, %v507_v57  ;;  %v2980_v44 = vld [vmem:[#allocation94_spill] sm:$0xff] }
  0x8a   :  { %1712 = vmatprep.subr.bf16.mxu0 %v1711_v39  ;;  %v2411_v9 = vpack.c.bf16 %v541_v23, %v529_v12  ;;  %v549_v52 = vand.u32 4294901760, %v548_v49  ;;  %v561_v11 = vand.u32 4294901760, %v560_v38  ;;  %v555_v1 = vand.u32 4294901760, %v554_v45 }
  0x8b   :  { %v567_v37 = vand.u32 4294901760, %v566_v61  ;;  %v573_v28 = vand.u32 4294901760, %v572_v46  ;;  %v585_v13 = vand.u32 4294901760, %v584_v29  ;;  %v1531_v40 = vpack.c.bf16 %v537_v5, %v525_v19  ;;  %v2988_v46 = vld [vmem:[#allocation27_spill] sm:$0xff]  ;;  %v2989_v29 = vld [vmem:[#allocation28_spill] sm:$0xff]  ;;  %v2990_v5 = vld [vmem:[#allocation29_spill] sm:$0xff] }
  0x8c   :  { %1522 = vmatpush1.bf16.msra.mxu1 %v2371_v25  ;;  %v2415_v39 = vpack.c.bf16 %v559_v51, %v547_v47  ;;  %v2420_v48 = vsub.f32 %v2978_v27, %v2852_v56  ;;  %v2850_v50 = vand.u32 4294901760, %v2980_v44  ;;  %v1533_v8 = vpack.c.bf16 %v543_v33, %v531_v15  ;;  %v2982_v33 = vld [vmem:[#allocation19_spill] sm:$0xff]  ;;  %v2983_v15 = vld [vmem:[#allocation20_spill] sm:$0xff] }
  0x8d   :  { %1714 = vmatpush1.bf16.msra.mxu0 %v2366_v22  ;;  %1524 = vmatprep.subr.bf16.mxu1 %v2377_v17  ;;  %v2428_v25 = vsub.f32 %v2979_v36, %v2851_v59  ;;  %v2981_v22 = vld [vmem:[#allocation96_spill] sm:$0xff]  ;;  %v2848_v63 = vand.u32 4294901760, %v2196_v58  ;;  %v1535_v12 = vpack.c.bf16 %v561_v11, %v549_v52  ;;  %v2432_v23 = vpack.c.bf16 %v565_v16, %v553_v20  ;;  %v2984_v20 = vld [vmem:[#allocation21_spill] sm:$0xff]  ;;  %v2985_v16 = vld [vmem:[#allocation22_spill] sm:$0xff] }
  0x8e   :  { %1716 = vmatprep.subr.bf16.mxu0 %v2368_v18  ;;  %v2849_v61 = vand.u32 4294901760, %v2981_v22  ;;  %v2434_v47 = vpack.c.bf16 %v583_v41, %v571_v14  ;;  %v2847_v51 = vand.u32 4294901760, %v2198_v43  ;;  %v1537_v17 = vpack.c.bf16 %v567_v37, %v555_v1  ;;  %v2986_v52 = vld [vmem:[#allocation23_spill] sm:$0xff]  ;;  %v2987_v14 = vld [vmem:[#allocation24_spill] sm:$0xff]  ;;  %v3012_v11 = vld [vmem:[#allocation65_spill] sm:$0xff] }
  0x8f   :  { %v2437_v10 = vpack.c.bf16 %v585_v13, %v573_v28  ;;  %v2846_v18 = vand.u32 4294901760, %v2205_v0  ;;  %v579_v26 = vand.u32 4294901760, %v2420_v48  ;;  %v2447_v41 = vsub.f32 %v2980_v44, %v2850_v50  ;;  %v2991_v28 = vld [vmem:[#allocation30_spill] sm:$0xff]  ;;  %v2992_v13 = vld [vmem:[#allocation31_spill] sm:$0xff]  ;;  %v3023_v37 = vld [vmem:[#allocation80_spill] sm:$0xff] }
  0x90   :  { %1526 = vmatpush1.bf16.msra.mxu1 %v1525_v21  ;;  %v591_v21 = vand.u32 4294901760, %v2428_v25  ;;  %v2461_v57 = vsub.f32 %v2196_v58, %v2848_v63  ;;  %v2855_v49 = vand.u32 4294901760, %v2218_v42  ;;  %v614_v38 = vsub.f32 %v2198_v43, %v2847_v51  ;;  %v3018_v1 = vld [vmem:[#allocation102_spill] sm:$0xff]  ;;  %v3021_v63 = vld [vmem:[#allocation77_spill] sm:$0xff]  ;;  %v3026_v56 = vld [vmem:[#allocation84_spill] sm:$0xff] }
  0x91   :  { %1718 = vmatpush1.bf16.msra.mxu0 %v2373_v3  ;;  %1528 = vmatprep.subr.bf16.mxu1 %v1527_v4  ;;  %v608_v3 = vsub.f32 %v2981_v22, %v2849_v61  ;;  %v2476_v19 = vsub.f32 %v2205_v0, %v2846_v18  ;;  %v597_v45 = vand.u32 4294901760, %v2447_v41  ;;  %v3005_v4 = vld [vmem:[#allocation51_spill] sm:$0xff]  ;;  %v3013_v41 = vld [vmem:[#allocation66_spill] sm:$0xff]  ;;  %v637_v51 = vand.u32 4294901760, %v3018_v1 }
  0x92   :  { %1720 = vmatprep.subr.bf16.mxu0 %v2386_v7  ;;  %v632_v7 = vsub.f32 %v2218_v42, %v2855_v49  ;;  %v3025_v61 = vld [vmem:[#allocation83_spill] sm:$0xff]  ;;  %v3030_v18 = vand.u32 4294901760, %v2979_v36  ;;  %v603_v49 = vand.u32 4294901760, %v2461_v57  ;;  %v615_v34 = vand.u32 4294901760, %v614_v38 }
  0x93   :  { %v609_v50 = vand.u32 4294901760, %v608_v3  ;;  %v1541_v3 = vpack.c.bf16 %v591_v21, %v579_v26  ;;  %v638_v59 = vsub.f32 %v3018_v1, %v637_v51  ;;  %v3031_v21 = vand.u32 4294901760, %v2980_v44 }
  0x94   :  { %1530 = vmatpush1.bf16.msra.mxu1 %v1529_v62  ;;  %v2999_v62 = vld [vmem:[#allocation100_spill] sm:$0xff]  ;;  %v1545_v57 = vpack.c.bf16 %v615_v34, %v603_v49  ;;  %v3033_v38 = vand.u32 4294901760, %v2196_v58  ;;  %v3037_v34 = vpack.c.bf16 %v2983_v15, %v2982_v33  ;;  %v3039_v49 = vld [vmem:[#allocation89_spill] sm:$0xff]  ;;  %v3044_v33 = vld [vmem:[#allocation91_spill] sm:$0xff] }
  0x95   :  { %1722 = vmatpush1.bf16.msra.mxu0 %v2400_v35  ;;  %1532 = vmatprep.subr.bf16.mxu1 %v1531_v40  ;;  %v625_v48 = vand.u32 4294901760, %v2999_v62  ;;  %v3019_v40 = vld [vmem:[#allocation74_spill] sm:$0xff]  ;;  %v1543_v26 = vpack.c.bf16 %v609_v50, %v597_v45  ;;  %v3036_v45 = vand.u32 4294901760, %v2218_v42  ;;  %v3045_v15 = vld [vmem:[#allocation87_spill] sm:$0xff] }
  0x96   :  { %1724 = vmatprep.subr.bf16.mxu0 %v1723_v24  ;;  %v3020_v24 = vld [vmem:[#allocation75_spill] sm:$0xff] }
  0x97   :  { %v626_v25 = vsub.f32 %v2999_v62, %v625_v48  ;;  %v639_v62 = vand.u32 4294901760, %v638_v59  ;;  %v3038_v59 = vld [vmem:[#allocation12_spill] sm:$0xff] }
  0x98   :  { %1534 = vmatpush1.bf16.msra.mxu1 %v1533_v8  ;;  %v3029_v8 = vand.u32 4294901760, %v2978_v27 }
  0x99   :  { %1726 = vmatpush1.bf16.msra.mxu0 %v2411_v9  ;;  %1536 = vmatprep.subr.bf16.mxu1 %v1535_v12  ;;  %v3028_v9 = vld [vmem:[#allocation88_spill] sm:$0xff] }
  0x9a   :  { %1728 = vmatprep.subr.bf16.mxu0 %v2415_v39  ;;  %v1733_v35 = vpack.c.bf16 %v3030_v18, %v3029_v8  ;;  %v3032_v39 = vand.u32 4294901760, %v2981_v22  ;;  %v3034_v8 = vand.u32 4294901760, %v2198_v43 }
  0x9c   :  { %1538 = vmatpush1.bf16.msra.mxu1 %v1537_v17  ;;  %v1735_v18 = vpack.c.bf16 %v3032_v39, %v3031_v21  ;;  %v621_v17 = vand.u32 4294901760, %v2476_v19  ;;  %v1737_v12 = vpack.c.bf16 %v3034_v8, %v3033_v38  ;;  %v1741_v19 = vpack.c.bf16 %v637_v51, %v625_v48  ;;  %v3043_v48 = vld [vmem:[#allocation14_spill] sm:$0xff]  ;;  %v3069_v38 = vld [vmem:[#allocation41_spill] sm:$0xff] }
  0x9d   :  { %1730 = vmatpush1.bf16.msra.mxu0 %v2432_v23  ;;  %1540 = vmatprep.subr.bf16.mxu1 %v2437_v10  ;;  %v633_v23 = vand.u32 4294901760, %v632_v7  ;;  %v627_v10 = vand.u32 4294901760, %v626_v25  ;;  %v3040_v25 = vpack.c.bf16 %v2985_v16, %v2984_v20  ;;  %v3042_v51 = vpack.c.bf16 %v2987_v14, %v2986_v52  ;;  %v3049_v16 = vld [vmem:[#allocation16_spill] sm:$0xff]  ;;  %v3051_v14 = vld [vmem:[#allocation17_spill] sm:$0xff] }
  0x9e   :  { %1732 = vmatprep.subr.bf16.mxu0 %v2434_v47  ;;  %v3035_v47 = vand.u32 4294901760, %v2205_v0  ;;  %v3048_v20 = vpack.c.bf16 %v2005_v2, %v1998_v60  ;;  %v3050_v52 = vpack.c.bf16 %v2989_v29, %v2988_v46  ;;  %v3055_v60 = vld [vmem:[#allocation25_spill] sm:$0xff]  ;;  %v3056_v2 = vld [vmem:[#allocation34_spill] sm:$0xff] }
  0x9f   :  { %v1547_v50 = vpack.c.bf16 %v633_v23, %v621_v17  ;;  %v1549_v7 = vpack.c.bf16 %v639_v62, %v627_v10  ;;  %v3041_v62 = vld [vmem:[#allocation13_spill] sm:$0xff]  ;;  %v3059_v46 = vld [vmem:[#allocation26_spill] sm:$0xff]  ;;  %v3071_v10 = vld [vmem:[#allocation40_spill] sm:$0xff] }
  0xa0   :  { %1542 = vmatpush1.bf16.msra.mxu1 %v1541_v3  ;;  %v1739_v39 = vpack.c.bf16 %v3036_v45, %v3035_v47  ;;  %v3052_v3 = vpack.c.bf16 %v2015_v6, %v2990_v5  ;;  %v3060_v29 = vld [vmem:[#allocation37_spill] sm:$0xff]  ;;  %v3063_v6 = vld [vmem:[#allocation32_spill] sm:$0xff]  ;;  %v3064_v5 = vld [vmem:[#allocation39_spill] sm:$0xff] }
  0xa1   :  { %1734 = vmatpush1.bf16.msra.mxu0 %v1733_v35  ;;  %1544 = vmatprep.subr.bf16.mxu1 %v1543_v26  ;;  %v3046_v35 = vpack.c.bf16 %v1992_v54, %v1990_v53  ;;  %v3053_v53 = vld [vmem:[#allocation18_spill] sm:$0xff]  ;;  %v3054_v54 = vpack.c.bf16 %v2992_v13, %v2991_v28  ;;  %v3057_v26 = vld [vmem:[#allocation33_spill] sm:$0xff]  ;;  %v3067_v28 = vld [vmem:[#allocation35_spill] sm:$0xff] }
  0xa2   :  { %1736 = vmatprep.subr.bf16.mxu0 %v1735_v18  ;;  %v3058_v21 = vpack.c.bf16 %v3056_v2, %v3057_v26  ;;  %v3061_v18 = vld [vmem:[#allocation36_spill] sm:$0xff]  ;;  %v3065_v23 = vld [vmem:[#allocation38_spill] sm:$0xff]  ;;  %v3099_v2 = vld [vmem:[#allocation69_spill] sm:$0xff] }
  0xa3   :  { %v3062_v17 = vpack.c.bf16 %v3060_v29, %v3061_v18  ;;  %v3068_v13 = vld [vmem:[#allocation42_spill] sm:$0xff]  ;;  %v3073_v47 = vld [vmem:[#allocation44_spill] sm:$0xff]  ;;  %v3104_v18 = vld [vmem:[#allocation71_spill] sm:$0xff] }
  0xa4   :  { %1546 = vmatpush1.bf16.msra.mxu1 %v1545_v57  ;;  %v3066_v57 = vpack.c.bf16 %v3064_v5, %v3065_v23  ;;  %v3070_v8 = vpack.c.bf16 %v3068_v13, %v3069_v38  ;;  %v3100_v26 = vld [vmem:[#allocation68_spill] sm:$0xff]  ;;  %v3107_v5 = vpack.c.bf16 %v3020_v24, %v3019_v40  ;;  %v3113_v13 = vpack.c.bf16 %v3026_v56, %v3025_v61  ;;  %v3114_v40 = vld [vmem:[#allocation82_spill] sm:$0xff]  ;;  %v3121_v56 = vld [vmem:[#allocation95_spill] sm:$0xff] }
  0xa5   :  { %1738 = vmatpush1.bf16.msra.mxu0 %v1737_v12  ;;  %1548 = vmatprep.subr.bf16.mxu1 %v1547_v50  ;;  %v3047_v12 = vld [vmem:[#allocation15_spill] sm:$0xff]  ;;  %v3072_v50 = vld [vmem:[#allocation45_spill] sm:$0xff]  ;;  %v3103_v29 = vld [vmem:[#allocation72_spill] sm:$0xff]  ;;  %v3122_v61 = vpack.c.bf16 %v2198_v43, %v2196_v58 }
  0xa6   :  { %1740 = vmatprep.subr.bf16.mxu0 %v1739_v39  ;;  %v3074_v45 = vpack.c.bf16 %v3072_v50, %v3073_v47  ;;  %v3075_v39 = vld [vmem:[#allocation43_spill] sm:$0xff]  ;;  %v3110_v23 = vld [vmem:[#allocation76_spill] sm:$0xff]  ;;  %v3115_v24 = vld [vmem:[#allocation86_spill] sm:$0xff] }
  0xa7   :  { %v3116_v38 = vpack.c.bf16 %v3028_v9, %v3115_v24  ;;  %v3123_v9 = vld [vmem:[#allocation98_spill] sm:$0xff] }
  0xa8   :  { %1550 = vmatpush1.bf16.msra.mxu1 %v1549_v7  ;;  %v3076_v7 = vld [vmem:[#allocation48_spill] sm:$0xff] }
  0xa9   :  { %1742 = vmatpush1.bf16.msra.mxu0 %v1741_v19  ;;  %1552 = vmatprep.subr.bf16.mxu1 %v3037_v34  ;;  %v3077_v19 = vld [vmem:[#allocation47_spill] sm:$0xff] }
  0xaa   :  { %1744 = vmatprep.subr.bf16.mxu0 %v3038_v59  ;;  %v3078_v34 = vpack.c.bf16 %v3076_v7, %v3077_v19  ;;  %v3079_v59 = vld [vmem:[#allocation46_spill] sm:$0xff] }
  0xab   :  { %644 = vmatmul.mubr.f32.vlgmr.msra.gmra.mrb[0].mxu1 %v3039_v49 }
  0xac   :  { %1253 = vmatmul.mubr.f32.vlgmr.msra.gmra.mrb[0].mxu0 %v3039_v49  ;;  %1554 = vmatpush1.bf16.msra.mxu1 %v3040_v25  ;;  %v3080_v25 = vld [vmem:[#allocation49_spill] sm:$0xff] }
  0xad   :  { %1746 = vmatpush1.bf16.msra.mxu0 %v3041_v62  ;;  %1556 = vmatprep.subr.bf16.mxu1 %v3042_v51  ;;  %v3081_v62 = vpack.c.bf16 %v3005_v4, %v3080_v25  ;;  %v3082_v51 = vld [vmem:[#allocation50_spill] sm:$0xff] }
  0xae   :  { %1748 = vmatprep.subr.bf16.mxu0 %v3043_v48  ;;  %844 = vmatprep.mubr.f32.mxu1 %v3044_v33  ;;  %v3083_v48 = vpack.c.bf16 %v3006_v31, %v2956_v30  ;;  %v3084_v33 = vld [vmem:[#allocation52_spill] sm:$0xff]  ;;  %v3092_v4 = vld [vmem:[#allocation58_spill] sm:$0xff]  ;;  %v3096_v31 = vld [vmem:[#allocation61_spill] sm:$0xff]  ;;  %v3097_v30 = vpack.c.bf16 %v3013_v41, %v3012_v11  ;;  %v3109_v41 = vpack.c.bf16 %v3022_v32, %v3021_v63 }
  0xaf   :  { %1388 = vmatprep.mubr.f32.mxu0 %v3045_v15  ;;  %v3085_v15 = vld [vmem:[#allocation57_spill] sm:$0xff]  ;;  %v3118_v63 = vpack.c.bf16 %v2979_v36, %v2978_v27  ;;  %v3125_v36 = vld [vmem:[#allocation99_spill] sm:$0xff]  ;;  %v3126_v27 = vld [vmem:[#allocation100_spill] sm:$0xff] }
  0xb0   :  { %1558 = vmatpush1.bf16.msra.mxu1 %v3046_v35  ;;  %v3086_v35 = vld [vmem:[#allocation56_spill] sm:$0xff]  ;;  %v3108_v11 = vld [vmem:[#allocation73_spill] sm:$0xff] }
  0xb1   :  { %1750 = vmatpush1.bf16.msra.mxu0 %v3047_v12  ;;  %1560 = vmatprep.subr.bf16.mxu1 %v3048_v20  ;;  %v3087_v12 = vpack.c.bf16 %v3085_v15, %v3086_v35  ;;  %v3088_v20 = vld [vmem:[#allocation55_spill] sm:$0xff]  ;;  %v3117_v32 = vld [vmem:[#allocation85_spill] sm:$0xff] }
  0xb2   :  { %1752 = vmatprep.subr.bf16.mxu0 %v3049_v16  ;;  %v3089_v16 = vld [vmem:[#allocation60_spill] sm:$0xff] }
  0xb4   :  { %1562 = vmatpush1.bf16.msra.mxu1 %v3050_v52  ;;  %v3090_v52 = vld [vmem:[#allocation59_spill] sm:$0xff] }
  0xb5   :  { %1754 = vmatpush1.bf16.msra.mxu0 %v3051_v14  ;;  %1564 = vmatprep.subr.bf16.mxu1 %v3052_v3  ;;  %v3091_v14 = vpack.c.bf16 %v3089_v16, %v3090_v52  ;;  %v3093_v3 = vld [vmem:[#allocation63_spill] sm:$0xff] }
  0xb6   :  { %1756 = vmatprep.subr.bf16.mxu0 %v3053_v53  ;;  %v3094_v53 = vld [vmem:[#allocation62_spill] sm:$0xff] }
  0xb8   :  { %1566 = vmatpush1.bf16.msra.mxu1 %v3054_v54  ;;  %v3095_v54 = vpack.c.bf16 %v3093_v3, %v3094_v53 }
  0xb9   :  { %1758 = vmatpush1.bf16.msra.mxu0 %v3055_v60  ;;  %1568 = vmatprep.subr.bf16.mxu1 %v3058_v21  ;;  %v3098_v60 = vld [vmem:[#allocation64_spill] sm:$0xff]  ;;  %v3101_v21 = vpack.c.bf16 %v3099_v2, %v3100_v26 }
  0xba   :  { %1760 = vmatprep.subr.bf16.mxu0 %v3059_v46  ;;  %v3102_v46 = vld [vmem:[#allocation67_spill] sm:$0xff] }
  0xbc   :  { %1570 = vmatpush1.bf16.msra.mxu1 %v3062_v17  ;;  %v3105_v17 = vpack.c.bf16 %v3103_v29, %v3104_v18 }
  0xbd   :  { %1762 = vmatpush1.bf16.msra.mxu0 %v3063_v6  ;;  %1572 = vmatprep.subr.bf16.mxu1 %v3066_v57  ;;  %v3106_v6 = vld [vmem:[#allocation70_spill] sm:$0xff]  ;;  %v3111_v57 = vpack.c.bf16 %v3024_v55, %v3023_v37  ;;  %v3119_v55 = vld [vmem:[#allocation92_spill] sm:$0xff]  ;;  %v3120_v37 = vpack.c.bf16 %v2981_v22, %v2980_v44  ;;  %v3128_v44 = vld [vmem:[#allocation101_spill] sm:$0xff] }
  0xbe   :  { %1764 = vmatprep.subr.bf16.mxu0 %v3067_v28  ;;  %v3112_v28 = vld [vmem:[#allocation79_spill] sm:$0xff]  ;;  %v3129_v22 = vld [vmem:[#allocation97_spill] sm:$0xff] }
  0xc0   :  { %1574 = vmatpush1.bf16.msra.mxu1 %v3070_v8  ;;  %v3124_v8 = vpack.c.bf16 %v2218_v42, %v2205_v0 }
  0xc1   :  { %1766 = vmatpush1.bf16.msra.mxu0 %v3071_v10  ;;  %1576 = vmatprep.subr.bf16.mxu1 %v3074_v45  ;;  %v3127_v10 = vpack.c.bf16 %v3018_v1, %v3126_v27 }
  0xc2   :  { %1768 = vmatprep.subr.bf16.mxu0 %v3075_v39 }
  0xc4   :  { %1578 = vmatpush1.bf16.msra.mxu1 %v3078_v34 }
  0xc5   :  { %1770 = vmatpush1.bf16.msra.mxu0 %v3079_v59  ;;  %1580 = vmatprep.subr.bf16.mxu1 %v3081_v62 }
  0xc6   :  { %1772 = vmatprep.subr.bf16.mxu0 %v3082_v51 }
  0xc8   :  { %1582 = vmatpush1.bf16.msra.mxu1 %v3083_v48 }
  0xc9   :  { %1774 = vmatpush1.bf16.msra.mxu0 %v3084_v33  ;;  %1584 = vmatprep.subr.bf16.mxu1 %v3087_v12 }
  0xca   :  { %1776 = vmatprep.subr.bf16.mxu0 %v3088_v20 }
  0xcc   :  { %1586 = vmatpush1.bf16.msra.mxu1 %v3091_v14 }
  0xcd   :  { %1778 = vmatpush1.bf16.msra.mxu0 %v3092_v4  ;;  %1588 = vmatprep.subr.bf16.mxu1 %v3095_v54 }
  0xce   :  { %1780 = vmatprep.subr.bf16.mxu0 %v3096_v31 }
  0xd0   :  { %1590 = vmatpush1.bf16.msra.mxu1 %v3097_v30 }
  0xd1   :  { %1782 = vmatpush1.bf16.msra.mxu0 %v3098_v60  ;;  %1592 = vmatprep.subr.bf16.mxu1 %v3101_v21 }
  0xd2   :  { %1784 = vmatprep.subr.bf16.mxu0 %v3102_v46 }
  0xd4   :  { %1594 = vmatpush1.bf16.msra.mxu1 %v3105_v17 }
  0xd5   :  { %1786 = vmatpush1.bf16.msra.mxu0 %v3106_v6  ;;  %1596 = vmatprep.subr.bf16.mxu1 %v3107_v5 }
  0xd6   :  { %1788 = vmatprep.subr.bf16.mxu0 %v3108_v11 }
  0xd8   :  { %1598 = vmatpush1.bf16.msra.mxu1 %v3109_v41 }
  0xd9   :  { %1790 = vmatpush1.bf16.msra.mxu0 %v3110_v23  ;;  %1600 = vmatprep.subr.bf16.mxu1 %v3111_v57 }
  0xda   :  { %1792 = vmatprep.subr.bf16.mxu0 %v3112_v28 }
  0xdc   :  { %1602 = vmatpush1.bf16.msra.mxu1 %v3113_v13 }
  0xdd   :  { %1794 = vmatpush1.bf16.msra.mxu0 %v3114_v40  ;;  %1604 = vmatprep.subr.bf16.mxu1 %v3116_v38 }
  0xde   :  { %1796 = vmatprep.subr.bf16.mxu0 %v3117_v32 }
  0xe0   :  { %1606 = vmatpush1.bf16.msra.mxu1 %v3118_v63 }
  0xe1   :  { %1798 = vmatpush1.bf16.msra.mxu0 %v3119_v55  ;;  %1608 = vmatprep.subr.bf16.mxu1 %v3120_v37 }
  0xe2   :  { %1800 = vmatprep.subr.bf16.mxu0 %v3121_v56 }
  0xe4   :  { %1610 = vmatpush1.bf16.msra.mxu1 %v3122_v61 }
  0xe5   :  { %1802 = vmatpush1.bf16.msra.mxu0 %v3123_v9  ;;  %1612 = vmatprep.subr.bf16.mxu1 %v3124_v8 }
  0xe6   :  { %1804 = vmatprep.subr.bf16.mxu0 %v3125_v36 }
  0xe8   :  { %1614 = vmatpush1.bf16.msra.mxu1 %v3127_v10 }
  0xe9   :  { %1806 = vmatpush1.bf16.msra.mxu0 %v3128_v44 }
  0xeb   :  { %847 = vmatmul.mubr.f32.vlgmr.msra.gmra.mrb[0].mxu1 %v3129_v22 }
  0xec   :  { %1390 = vmatmul.mubr.f32.vlgmr.msra.gmra.mrb[0].mxu0 %v3039_v49 }
 0x1be   :  { %v848_v58 = vpop.f32.mrb[0].mxu1 }
 0x1bf   :  { %v1391_v43 = vpop.f32.mrb[0].mxu0  ;;  %v850_v47 = vpop.f32.mrb[1].mxu1 }
 0x1c0   :  { %v1807_v50 = vadd.f32 %v1391_v43, %v848_v58  ;;  %v1393_v0 = vpop.f32.mrb[1].mxu0 }
 0x1c1   :  { %v1808_v42 = vadd.f32 %v1393_v0, %v850_v47 }
 0x1c2   :  { %1405 = vst [vmem:[#allocation8] sm:$0xff] %v1807_v50 }
 0x1c3   :  { %1406 = vst [vmem:[#allocation8 + $0x8] sm:$0xff] %v1808_v42 }
 0x1c4   :  { %1877 = shalt.err (!%p1874_p6)
}
 0x1c5   :  { %s1878_s10 = scalar_lea.hbm %s2710_s2, 256 }
 0x1c6   :  { %p1879_p7 = scmp.ne.s32.totalorder %s2710_s2, %s1878_s10  ;;  %p1882_p8 = scmp.lt.u32.totalorder %s1878_s10, %s2710_s2 }
 0x1c8   :  { %p1884_p9 = pnand %p1882_p8, %p1879_p7 }
 0x1ca   :  { %1887 = shalt.err (!%p1884_p9)
}
 0x1cb   :  { %1416 = dma.vmem_to_hbm [thread:$0]  %s1414_s6, 256, %s2710_s2, [#allocation5]  }
 0x1cc   :  { %1892 = dma.done.wait [#allocation5], 256  }
 0x1cd   :  { %1893 = vsyncadd [#allocation5], 4294967040 }
 0x1ce   :  { %1420 = vsyncpa [#allocation4], 1 }
 0x1cf   :  { %1421 = vsyncpa [#allocation7], 1 }
 0x1d0   :  { %1422 = vsyncpa [#allocation5], 1 }

</bundles_post_ra>
